<compile_context>
chip_gen: v7x
topology: tpu7x:2x2x1
jax: 0.10.0
libtpu: 0.0.40
codegen_flags: <defaults>
</compile_context>

<pallas_src>
import jax
import jax.numpy as jnp
from jax.experimental import pallas as pl
from jax.experimental.pallas import tpu as pltpu


def gcn7_kernel(a_ref, x_ref,
                w1_ref, b1_ref, w2_ref, b2_ref, w3_ref, b3_ref,
                w4_ref, b4_ref, w5_ref, b5_ref, wc_ref, bc_ref,
                out_ref):
    G, N, _ = a_ref.shape
    a_bf = a_ref[...]                       # (G, N, N) bf16, resident across all 5 layers

    def aggregate(h):
        # Per-graph A_g @ H_g, statically unrolled over the G graphs in this block.
        # h: flat (G*N, F) f32 -> (G*N, F) f32 (bf16 MXU operands, f32 accumulation).
        h_bf = h.astype(jnp.bfloat16)
        parts = [
            jnp.dot(a_bf[g], h_bf[g * N:(g + 1) * N, :],
                    preferred_element_type=jnp.float32)
            for g in range(G)
        ]
        return jnp.concatenate(parts, axis=0)

    def transform(h, w_ref):
        # Fused across all G graphs: (G*N, F_in) @ (F_in, F_out) -> full MXU row fill.
        return jnp.dot(h.astype(jnp.bfloat16),
                       w_ref[...].astype(jnp.bfloat16),
                       preferred_element_type=jnp.float32)

    def conv_expand(h, w_ref, b_ref):       # F_in <= F_out: (A @ H) @ W + b
        return transform(aggregate(h), w_ref) + b_ref[...]

    def conv_shrink(h, w_ref, b_ref):       # F_in >  F_out: A @ (H @ W) + b
        return aggregate(transform(h, w_ref)) + b_ref[...]

    h = x_ref[...].reshape(G * N, x_ref.shape[-1])       # flat (G*N, in_feats) f32

    h = jnp.maximum(conv_expand(h, w1_ref, b1_ref), 0.0)  # in_feats -> h
    h = jnp.maximum(conv_expand(h, w2_ref, b2_ref), 0.0)  # h -> 2h
    h = jnp.maximum(conv_expand(h, w3_ref, b3_ref), 0.0)  # 2h -> 3h
    h = jnp.maximum(conv_shrink(h, w4_ref, b4_ref), 0.0)  # 3h -> 2h
    h = conv_shrink(h, w5_ref, b5_ref)                     # 2h -> h, no ReLU

    # dgl.max_nodes: per-graph max over the N nodes -> (G, h_feats), stays f32.
    hg = jnp.max(h.reshape(G, N, h.shape[-1]), axis=1)

    # Linear classifier fused over the whole G-graph block: one (G, num_classes) store.
    out_ref[...] = (jnp.dot(hg.astype(jnp.bfloat16),
                            wc_ref[...].astype(jnp.bfloat16),
                            preferred_element_type=jnp.float32)
                    + bc_ref[...])


PARAM_ORDER = ["w1", "b1", "w2", "b2", "w3", "b3",
               "w4", "b4", "w5", "b5", "wc", "bc"]


def gcn7_forward(a_norm, x, params, *, graphs_per_step=8):
    B, N, _ = a_norm.shape
    G = graphs_per_step
    assert B % G == 0, "batch must be divisible by graphs_per_step"
    in_feats = x.shape[-1]
    num_classes = params["wc"].shape[1]

    # bf16 adjacency at the call boundary: halves the dominant HBM->VMEM bytes and feeds
    # the MXU its fast bf16 path; accumulation stays f32 inside the kernel.
    a_bf16 = a_norm.astype(jnp.bfloat16)

    in_specs = [
        pl.BlockSpec((G, N, N), lambda b: (b, 0, 0)),
        pl.BlockSpec((G, N, in_feats), lambda b: (b, 0, 0)),
    ]
    args = [a_bf16, x]
    for name in PARAM_ORDER:
        p = params[name]
        # Constant-index blocks: weights/biases are fetched once and reused every step.
        in_specs.append(pl.BlockSpec(p.shape, lambda b, nd=p.ndim: (0,) * nd))
        args.append(p)

    return pl.pallas_call(
        gcn7_kernel,
        out_shape=jax.ShapeDtypeStruct((B, num_classes), jnp.float32),
        grid=(B // G,),
        in_specs=in_specs,
        out_specs=pl.BlockSpec((G, num_classes), lambda b: (b, 0)),
        compiler_params=pltpu.CompilerParams(
            dimension_semantics=("parallel",)),
    )(*args)


def gcn7_reference(a_norm, x, params):
    """Pure-JAX f32 reference of the same forward pass (canonical (A@H)@W + b order)."""
    h = x
    layers = [("w1", "b1"), ("w2", "b2"), ("w3", "b3"), ("w4", "b4"), ("w5", "b5")]
    for i, (wn, bn) in enumerate(layers):
        h = jnp.einsum("bnm,bmf->bnf", a_norm, h) @ params[wn] + params[bn]
        if i < 4:
            h = jnp.maximum(h, 0.0)
    hg = jnp.max(h, axis=1)                        # (B, h_feats)
    return hg @ params["wc"] + params["bc"][0]


def init_params(key, in_feats, h_feats, num_classes):
    """Deterministic xavier-uniform weights, zero biases (matches DGL/torch defaults)."""
    dims = [(in_feats, h_feats), (h_feats, 2 * h_feats), (2 * h_feats, 3 * h_feats),
            (3 * h_feats, 2 * h_feats), (2 * h_feats, h_feats), (h_feats, num_classes)]
    names = ["1", "2", "3", "4", "5", "c"]
    params = {}
    keys = jax.random.split(key, len(dims))
    for k, (fin, fout), n in zip(keys, dims, names):
        bound = (6.0 / (fin + fout)) ** 0.5
        params["w" + n] = jax.random.uniform(k, (fin, fout), jnp.float32, -bound, bound)
        params["b" + n] = jnp.zeros((1, fout), jnp.float32)
    return params


def build_normalized_adjacency(key, B, N):
    """Random symmetric graph with self-loops, then D^-1/2 (A+I) D^-1/2."""
    raw = jax.random.uniform(key, (B, N, N))
    adj = (raw < 0.3).astype(jnp.float32)
    adj = jnp.maximum(adj, jnp.swapaxes(adj, 1, 2))               # symmetrize
    adj = jnp.maximum(adj, jnp.eye(N, dtype=jnp.float32)[None])   # self-loops
    deg = jnp.sum(adj, axis=-1)                                    # (B, N)
    d_inv_sqrt = 1.0 / jnp.sqrt(deg)
    return d_inv_sqrt[:, :, None] * adj * d_inv_sqrt[:, None, :]


if __name__ == "__main__":
    B, N, G = 16, 16, 8                      # G*N = 128 rows per fused matmul; grid = 2
    in_feats, h_feats, num_classes = 8, 32, 4

    key = jax.random.PRNGKey(0)
    k_graph, k_feat, k_param = jax.random.split(key, 3)

    a_norm = build_normalized_adjacency(k_graph, B, N)
    x = jax.random.normal(k_feat, (B, N, in_feats), jnp.float32)
    params = init_params(k_param, in_feats, h_feats, num_classes)

    out = gcn7_forward(a_norm, x, params, graphs_per_step=G)
    out = jax.block_until_ready(out)

    ref = gcn7_reference(a_norm, x, params)
    assert out.shape == (B, num_classes)
    # bf16 MXU operands (f32 accumulation) -> bf16-appropriate tolerance vs f32 reference.
    assert jnp.all(jnp.isfinite(out))
    assert jnp.allclose(out, ref, atol=3e-2, rtol=3e-2), (out, ref)

    print("KERNEL_OK")
</pallas_src>

<mosaic_0001>
module attributes {stable_mosaic.version = 11 : i64} {
  func.func @gcn7_kernel(%arg0: i32, %arg1: memref<8x16x16xbf16, #tpu.memory_space<vmem>>, %arg2: memref<8x16x8xf32, #tpu.memory_space<vmem>>, %arg3: memref<8x32xf32, #tpu.memory_space<vmem>>, %arg4: memref<1x32xf32, #tpu.memory_space<vmem>>, %arg5: memref<32x64xf32, #tpu.memory_space<vmem>>, %arg6: memref<1x64xf32, #tpu.memory_space<vmem>>, %arg7: memref<64x96xf32, #tpu.memory_space<vmem>>, %arg8: memref<1x96xf32, #tpu.memory_space<vmem>>, %arg9: memref<96x64xf32, #tpu.memory_space<vmem>>, %arg10: memref<1x64xf32, #tpu.memory_space<vmem>>, %arg11: memref<64x32xf32, #tpu.memory_space<vmem>>, %arg12: memref<1x32xf32, #tpu.memory_space<vmem>>, %arg13: memref<32x4xf32, #tpu.memory_space<vmem>>, %arg14: memref<1x4xf32, #tpu.memory_space<vmem>>, %arg15: memref<8x4xf32, #tpu.memory_space<vmem>>) attributes {dimension_semantics = [#tpu.dimension_semantics<parallel>], iteration_bounds = array<i64: 2>, scalar_prefetch = 0 : i64, scratch_operands = 0 : i64, tpu.core_type = #tpu.core_type<tc>, window_params = [{transform_indices = @transform_0, window_bounds = array<i64: 8, 16, 16>}, {transform_indices = @transform_1, window_bounds = array<i64: 8, 16, 8>}, {pipeline_mode = #tpu.pipeline_mode<synchronous>, transform_indices = @transform_2, window_bounds = array<i64: 8, 32>}, {pipeline_mode = #tpu.pipeline_mode<synchronous>, transform_indices = @transform_3, window_bounds = array<i64: 1, 32>}, {pipeline_mode = #tpu.pipeline_mode<synchronous>, transform_indices = @transform_4, window_bounds = array<i64: 32, 64>}, {pipeline_mode = #tpu.pipeline_mode<synchronous>, transform_indices = @transform_5, window_bounds = array<i64: 1, 64>}, {pipeline_mode = #tpu.pipeline_mode<synchronous>, transform_indices = @transform_6, window_bounds = array<i64: 64, 96>}, {pipeline_mode = #tpu.pipeline_mode<synchronous>, transform_indices = @transform_7, window_bounds = array<i64: 1, 96>}, {pipeline_mode = #tpu.pipeline_mode<synchronous>, transform_indices = @transform_8, window_bounds = array<i64: 96, 64>}, {pipeline_mode = #tpu.pipeline_mode<synchronous>, transform_indices = @transform_9, window_bounds = array<i64: 1, 64>}, {pipeline_mode = #tpu.pipeline_mode<synchronous>, transform_indices = @transform_10, window_bounds = array<i64: 64, 32>}, {pipeline_mode = #tpu.pipeline_mode<synchronous>, transform_indices = @transform_11, window_bounds = array<i64: 1, 32>}, {pipeline_mode = #tpu.pipeline_mode<synchronous>, transform_indices = @transform_12, window_bounds = array<i64: 32, 4>}, {pipeline_mode = #tpu.pipeline_mode<synchronous>, transform_indices = @transform_13, window_bounds = array<i64: 1, 4>}, {transform_indices = @transform_14, window_bounds = array<i64: 8, 4>}]} {
    %c0 = arith.constant 0 : index
    %c0_0 = arith.constant 0 : index
    %c0_1 = arith.constant 0 : index
    %0 = vector.load %arg1[%c0, %c0_0, %c0_1] : memref<8x16x16xbf16, #tpu.memory_space<vmem>>, vector<8x16x16xbf16>
    %c0_2 = arith.constant 0 : index
    %c0_3 = arith.constant 0 : index
    %c0_4 = arith.constant 0 : index
    %1 = vector.load %arg2[%c0_2, %c0_3, %c0_4] : memref<8x16x8xf32, #tpu.memory_space<vmem>>, vector<8x16x8xf32>
    %2 = vector.shape_cast %1 : vector<8x16x8xf32> to vector<128x8xf32>
    %3 = arith.truncf %2 : vector<128x8xf32> to vector<128x8xbf16>
    %4 = vector.extract_strided_slice %0 {offsets = [0, 0, 0], sizes = [1, 16, 16], strides = [1, 1, 1]} : vector<8x16x16xbf16> to vector<1x16x16xbf16>
    %5 = vector.shape_cast %4 : vector<1x16x16xbf16> to vector<16x16xbf16>
    %6 = vector.extract_strided_slice %3 {offsets = [0, 0], sizes = [16, 8], strides = [1, 1]} : vector<128x8xbf16> to vector<16x8xbf16>
    %cst = arith.constant dense<0.000000e+00> : vector<16x8xf32>
    %7 = tpu.matmul %5, %6, %cst {dimension_numbers = #tpu.dot_dimension_numbers<[1], [0], [0], [1], [0, 0, 1, 1], [], []>} : vector<16x16xbf16>, vector<16x8xbf16>, vector<16x8xf32> -> vector<16x8xf32>
    %8 = vector.extract_strided_slice %0 {offsets = [1, 0, 0], sizes = [1, 16, 16], strides = [1, 1, 1]} : vector<8x16x16xbf16> to vector<1x16x16xbf16>
    %9 = vector.shape_cast %8 : vector<1x16x16xbf16> to vector<16x16xbf16>
    %10 = vector.extract_strided_slice %3 {offsets = [16, 0], sizes = [16, 8], strides = [1, 1]} : vector<128x8xbf16> to vector<16x8xbf16>
    %cst_5 = arith.constant dense<0.000000e+00> : vector<16x8xf32>
    %11 = tpu.matmul %9, %10, %cst_5 {dimension_numbers = #tpu.dot_dimension_numbers<[1], [0], [0], [1], [0, 0, 1, 1], [], []>} : vector<16x16xbf16>, vector<16x8xbf16>, vector<16x8xf32> -> vector<16x8xf32>
    %12 = vector.extract_strided_slice %0 {offsets = [2, 0, 0], sizes = [1, 16, 16], strides = [1, 1, 1]} : vector<8x16x16xbf16> to vector<1x16x16xbf16>
    %13 = vector.shape_cast %12 : vector<1x16x16xbf16> to vector<16x16xbf16>
    %14 = vector.extract_strided_slice %3 {offsets = [32, 0], sizes = [16, 8], strides = [1, 1]} : vector<128x8xbf16> to vector<16x8xbf16>
    %cst_6 = arith.constant dense<0.000000e+00> : vector<16x8xf32>
    %15 = tpu.matmul %13, %14, %cst_6 {dimension_numbers = #tpu.dot_dimension_numbers<[1], [0], [0], [1], [0, 0, 1, 1], [], []>} : vector<16x16xbf16>, vector<16x8xbf16>, vector<16x8xf32> -> vector<16x8xf32>
    %16 = vector.extract_strided_slice %0 {offsets = [3, 0, 0], sizes = [1, 16, 16], strides = [1, 1, 1]} : vector<8x16x16xbf16> to vector<1x16x16xbf16>
    %17 = vector.shape_cast %16 : vector<1x16x16xbf16> to vector<16x16xbf16>
    %18 = vector.extract_strided_slice %3 {offsets = [48, 0], sizes = [16, 8], strides = [1, 1]} : vector<128x8xbf16> to vector<16x8xbf16>
    %cst_7 = arith.constant dense<0.000000e+00> : vector<16x8xf32>
    %19 = tpu.matmul %17, %18, %cst_7 {dimension_numbers = #tpu.dot_dimension_numbers<[1], [0], [0], [1], [0, 0, 1, 1], [], []>} : vector<16x16xbf16>, vector<16x8xbf16>, vector<16x8xf32> -> vector<16x8xf32>
    %20 = vector.extract_strided_slice %0 {offsets = [4, 0, 0], sizes = [1, 16, 16], strides = [1, 1, 1]} : vector<8x16x16xbf16> to vector<1x16x16xbf16>
    %21 = vector.shape_cast %20 : vector<1x16x16xbf16> to vector<16x16xbf16>
    %22 = vector.extract_strided_slice %3 {offsets = [64, 0], sizes = [16, 8], strides = [1, 1]} : vector<128x8xbf16> to vector<16x8xbf16>
    %cst_8 = arith.constant dense<0.000000e+00> : vector<16x8xf32>
    %23 = tpu.matmul %21, %22, %cst_8 {dimension_numbers = #tpu.dot_dimension_numbers<[1], [0], [0], [1], [0, 0, 1, 1], [], []>} : vector<16x16xbf16>, vector<16x8xbf16>, vector<16x8xf32> -> vector<16x8xf32>
    %24 = vector.extract_strided_slice %0 {offsets = [5, 0, 0], sizes = [1, 16, 16], strides = [1, 1, 1]} : vector<8x16x16xbf16> to vector<1x16x16xbf16>
    %25 = vector.shape_cast %24 : vector<1x16x16xbf16> to vector<16x16xbf16>
    %26 = vector.extract_strided_slice %3 {offsets = [80, 0], sizes = [16, 8], strides = [1, 1]} : vector<128x8xbf16> to vector<16x8xbf16>
    %cst_9 = arith.constant dense<0.000000e+00> : vector<16x8xf32>
    %27 = tpu.matmul %25, %26, %cst_9 {dimension_numbers = #tpu.dot_dimension_numbers<[1], [0], [0], [1], [0, 0, 1, 1], [], []>} : vector<16x16xbf16>, vector<16x8xbf16>, vector<16x8xf32> -> vector<16x8xf32>
    %28 = vector.extract_strided_slice %0 {offsets = [6, 0, 0], sizes = [1, 16, 16], strides = [1, 1, 1]} : vector<8x16x16xbf16> to vector<1x16x16xbf16>
    %29 = vector.shape_cast %28 : vector<1x16x16xbf16> to vector<16x16xbf16>
    %30 = vector.extract_strided_slice %3 {offsets = [96, 0], sizes = [16, 8], strides = [1, 1]} : vector<128x8xbf16> to vector<16x8xbf16>
    %cst_10 = arith.constant dense<0.000000e+00> : vector<16x8xf32>
    %31 = tpu.matmul %29, %30, %cst_10 {dimension_numbers = #tpu.dot_dimension_numbers<[1], [0], [0], [1], [0, 0, 1, 1], [], []>} : vector<16x16xbf16>, vector<16x8xbf16>, vector<16x8xf32> -> vector<16x8xf32>
    %32 = vector.extract_strided_slice %0 {offsets = [7, 0, 0], sizes = [1, 16, 16], strides = [1, 1, 1]} : vector<8x16x16xbf16> to vector<1x16x16xbf16>
    %33 = vector.shape_cast %32 : vector<1x16x16xbf16> to vector<16x16xbf16>
    %34 = vector.extract_strided_slice %3 {offsets = [112, 0], sizes = [16, 8], strides = [1, 1]} : vector<128x8xbf16> to vector<16x8xbf16>
    %cst_11 = arith.constant dense<0.000000e+00> : vector<16x8xf32>
    %35 = tpu.matmul %33, %34, %cst_11 {dimension_numbers = #tpu.dot_dimension_numbers<[1], [0], [0], [1], [0, 0, 1, 1], [], []>} : vector<16x16xbf16>, vector<16x8xbf16>, vector<16x8xf32> -> vector<16x8xf32>
    %36 = tpu.concatenate %7, %11, %15, %19, %23, %27, %31, %35 in 0 : vector<16x8xf32>, vector<16x8xf32>, vector<16x8xf32>, vector<16x8xf32>, vector<16x8xf32>, vector<16x8xf32>, vector<16x8xf32>, vector<16x8xf32> -> vector<128x8xf32>
    %37 = arith.truncf %36 : vector<128x8xf32> to vector<128x8xbf16>
    %c0_12 = arith.constant 0 : index
    %c0_13 = arith.constant 0 : index
    %38 = vector.load %arg3[%c0_12, %c0_13] : memref<8x32xf32, #tpu.memory_space<vmem>>, vector<8x32xf32>
    %39 = arith.truncf %38 : vector<8x32xf32> to vector<8x32xbf16>
    %cst_14 = arith.constant dense<0.000000e+00> : vector<128x32xf32>
    %40 = tpu.matmul %37, %39, %cst_14 {dimension_numbers = #tpu.dot_dimension_numbers<[1], [0], [0], [1], [0, 0, 1, 1], [], []>} : vector<128x8xbf16>, vector<8x32xbf16>, vector<128x32xf32> -> vector<128x32xf32>
    %c0_15 = arith.constant 0 : index
    %c0_16 = arith.constant 0 : index
    %41 = vector.load %arg4[%c0_15, %c0_16] : memref<1x32xf32, #tpu.memory_space<vmem>>, vector<1x32xf32>
    %42 = vector.broadcast %41 : vector<1x32xf32> to vector<128x32xf32>
    %43 = arith.addf %40, %42 : vector<128x32xf32>
    %cst_17 = arith.constant 0.000000e+00 : f32
    %44 = vector.broadcast %cst_17 : f32 to vector<128x32xf32>
    %45 = arith.maximumf %43, %44 : vector<128x32xf32>
    %46 = arith.truncf %45 : vector<128x32xf32> to vector<128x32xbf16>
    %47 = vector.extract_strided_slice %0 {offsets = [0, 0, 0], sizes = [1, 16, 16], strides = [1, 1, 1]} : vector<8x16x16xbf16> to vector<1x16x16xbf16>
    %48 = vector.shape_cast %47 : vector<1x16x16xbf16> to vector<16x16xbf16>
    %49 = vector.extract_strided_slice %46 {offsets = [0, 0], sizes = [16, 32], strides = [1, 1]} : vector<128x32xbf16> to vector<16x32xbf16>
    %cst_18 = arith.constant dense<0.000000e+00> : vector<16x32xf32>
    %50 = tpu.matmul %48, %49, %cst_18 {dimension_numbers = #tpu.dot_dimension_numbers<[1], [0], [0], [1], [0, 0, 1, 1], [], []>} : vector<16x16xbf16>, vector<16x32xbf16>, vector<16x32xf32> -> vector<16x32xf32>
    %51 = vector.extract_strided_slice %0 {offsets = [1, 0, 0], sizes = [1, 16, 16], strides = [1, 1, 1]} : vector<8x16x16xbf16> to vector<1x16x16xbf16>
    %52 = vector.shape_cast %51 : vector<1x16x16xbf16> to vector<16x16xbf16>
    %53 = vector.extract_strided_slice %46 {offsets = [16, 0], sizes = [16, 32], strides = [1, 1]} : vector<128x32xbf16> to vector<16x32xbf16>
    %cst_19 = arith.constant dense<0.000000e+00> : vector<16x32xf32>
    %54 = tpu.matmul %52, %53, %cst_19 {dimension_numbers = #tpu.dot_dimension_numbers<[1], [0], [0], [1], [0, 0, 1, 1], [], []>} : vector<16x16xbf16>, vector<16x32xbf16>, vector<16x32xf32> -> vector<16x32xf32>
    %55 = vector.extract_strided_slice %0 {offsets = [2, 0, 0], sizes = [1, 16, 16], strides = [1, 1, 1]} : vector<8x16x16xbf16> to vector<1x16x16xbf16>
    %56 = vector.shape_cast %55 : vector<1x16x16xbf16> to vector<16x16xbf16>
    %57 = vector.extract_strided_slice %46 {offsets = [32, 0], sizes = [16, 32], strides = [1, 1]} : vector<128x32xbf16> to vector<16x32xbf16>
    %cst_20 = arith.constant dense<0.000000e+00> : vector<16x32xf32>
    %58 = tpu.matmul %56, %57, %cst_20 {dimension_numbers = #tpu.dot_dimension_numbers<[1], [0], [0], [1], [0, 0, 1, 1], [], []>} : vector<16x16xbf16>, vector<16x32xbf16>, vector<16x32xf32> -> vector<16x32xf32>
    %59 = vector.extract_strided_slice %0 {offsets = [3, 0, 0], sizes = [1, 16, 16], strides = [1, 1, 1]} : vector<8x16x16xbf16> to vector<1x16x16xbf16>
    %60 = vector.shape_cast %59 : vector<1x16x16xbf16> to vector<16x16xbf16>
    %61 = vector.extract_strided_slice %46 {offsets = [48, 0], sizes = [16, 32], strides = [1, 1]} : vector<128x32xbf16> to vector<16x32xbf16>
    %cst_21 = arith.constant dense<0.000000e+00> : vector<16x32xf32>
    %62 = tpu.matmul %60, %61, %cst_21 {dimension_numbers = #tpu.dot_dimension_numbers<[1], [0], [0], [1], [0, 0, 1, 1], [], []>} : vector<16x16xbf16>, vector<16x32xbf16>, vector<16x32xf32> -> vector<16x32xf32>
    %63 = vector.extract_strided_slice %0 {offsets = [4, 0, 0], sizes = [1, 16, 16], strides = [1, 1, 1]} : vector<8x16x16xbf16> to vector<1x16x16xbf16>
    %64 = vector.shape_cast %63 : vector<1x16x16xbf16> to vector<16x16xbf16>
    %65 = vector.extract_strided_slice %46 {offsets = [64, 0], sizes = [16, 32], strides = [1, 1]} : vector<128x32xbf16> to vector<16x32xbf16>
    %cst_22 = arith.constant dense<0.000000e+00> : vector<16x32xf32>
    %66 = tpu.matmul %64, %65, %cst_22 {dimension_numbers = #tpu.dot_dimension_numbers<[1], [0], [0], [1], [0, 0, 1, 1], [], []>} : vector<16x16xbf16>, vector<16x32xbf16>, vector<16x32xf32> -> vector<16x32xf32>
    %67 = vector.extract_strided_slice %0 {offsets = [5, 0, 0], sizes = [1, 16, 16], strides = [1, 1, 1]} : vector<8x16x16xbf16> to vector<1x16x16xbf16>
    %68 = vector.shape_cast %67 : vector<1x16x16xbf16> to vector<16x16xbf16>
    %69 = vector.extract_strided_slice %46 {offsets = [80, 0], sizes = [16, 32], strides = [1, 1]} : vector<128x32xbf16> to vector<16x32xbf16>
    %cst_23 = arith.constant dense<0.000000e+00> : vector<16x32xf32>
    %70 = tpu.matmul %68, %69, %cst_23 {dimension_numbers = #tpu.dot_dimension_numbers<[1], [0], [0], [1], [0, 0, 1, 1], [], []>} : vector<16x16xbf16>, vector<16x32xbf16>, vector<16x32xf32> -> vector<16x32xf32>
    %71 = vector.extract_strided_slice %0 {offsets = [6, 0, 0], sizes = [1, 16, 16], strides = [1, 1, 1]} : vector<8x16x16xbf16> to vector<1x16x16xbf16>
    %72 = vector.shape_cast %71 : vector<1x16x16xbf16> to vector<16x16xbf16>
    %73 = vector.extract_strided_slice %46 {offsets = [96, 0], sizes = [16, 32], strides = [1, 1]} : vector<128x32xbf16> to vector<16x32xbf16>
    %cst_24 = arith.constant dense<0.000000e+00> : vector<16x32xf32>
    %74 = tpu.matmul %72, %73, %cst_24 {dimension_numbers = #tpu.dot_dimension_numbers<[1], [0], [0], [1], [0, 0, 1, 1], [], []>} : vector<16x16xbf16>, vector<16x32xbf16>, vector<16x32xf32> -> vector<16x32xf32>
    %75 = vector.extract_strided_slice %0 {offsets = [7, 0, 0], sizes = [1, 16, 16], strides = [1, 1, 1]} : vector<8x16x16xbf16> to vector<1x16x16xbf16>
    %76 = vector.shape_cast %75 : vector<1x16x16xbf16> to vector<16x16xbf16>
    %77 = vector.extract_strided_slice %46 {offsets = [112, 0], sizes = [16, 32], strides = [1, 1]} : vector<128x32xbf16> to vector<16x32xbf16>
    %cst_25 = arith.constant dense<0.000000e+00> : vector<16x32xf32>
    %78 = tpu.matmul %76, %77, %cst_25 {dimension_numbers = #tpu.dot_dimension_numbers<[1], [0], [0], [1], [0, 0, 1, 1], [], []>} : vector<16x16xbf16>, vector<16x32xbf16>, vector<16x32xf32> -> vector<16x32xf32>
    %79 = tpu.concatenate %50, %54, %58, %62, %66, %70, %74, %78 in 0 : vector<16x32xf32>, vector<16x32xf32>, vector<16x32xf32>, vector<16x32xf32>, vector<16x32xf32>, vector<16x32xf32>, vector<16x32xf32>, vector<16x32xf32> -> vector<128x32xf32>
    %80 = arith.truncf %79 : vector<128x32xf32> to vector<128x32xbf16>
    %c0_26 = arith.constant 0 : index
    %c0_27 = arith.constant 0 : index
    %81 = vector.load %arg5[%c0_26, %c0_27] : memref<32x64xf32, #tpu.memory_space<vmem>>, vector<32x64xf32>
    %82 = arith.truncf %81 : vector<32x64xf32> to vector<32x64xbf16>
    %cst_28 = arith.constant dense<0.000000e+00> : vector<128x64xf32>
    %83 = tpu.matmul %80, %82, %cst_28 {dimension_numbers = #tpu.dot_dimension_numbers<[1], [0], [0], [1], [0, 0, 1, 1], [], []>} : vector<128x32xbf16>, vector<32x64xbf16>, vector<128x64xf32> -> vector<128x64xf32>
    %c0_29 = arith.constant 0 : index
    %c0_30 = arith.constant 0 : index
    %84 = vector.load %arg6[%c0_29, %c0_30] : memref<1x64xf32, #tpu.memory_space<vmem>>, vector<1x64xf32>
    %85 = vector.broadcast %84 : vector<1x64xf32> to vector<128x64xf32>
    %86 = arith.addf %83, %85 : vector<128x64xf32>
    %cst_31 = arith.constant 0.000000e+00 : f32
    %87 = vector.broadcast %cst_31 : f32 to vector<128x64xf32>
    %88 = arith.maximumf %86, %87 : vector<128x64xf32>
    %89 = arith.truncf %88 : vector<128x64xf32> to vector<128x64xbf16>
    %90 = vector.extract_strided_slice %0 {offsets = [0, 0, 0], sizes = [1, 16, 16], strides = [1, 1, 1]} : vector<8x16x16xbf16> to vector<1x16x16xbf16>
    %91 = vector.shape_cast %90 : vector<1x16x16xbf16> to vector<16x16xbf16>
    %92 = vector.extract_strided_slice %89 {offsets = [0, 0], sizes = [16, 64], strides = [1, 1]} : vector<128x64xbf16> to vector<16x64xbf16>
    %cst_32 = arith.constant dense<0.000000e+00> : vector<16x64xf32>
    %93 = tpu.matmul %91, %92, %cst_32 {dimension_numbers = #tpu.dot_dimension_numbers<[1], [0], [0], [1], [0, 0, 1, 1], [], []>} : vector<16x16xbf16>, vector<16x64xbf16>, vector<16x64xf32> -> vector<16x64xf32>
    %94 = vector.extract_strided_slice %0 {offsets = [1, 0, 0], sizes = [1, 16, 16], strides = [1, 1, 1]} : vector<8x16x16xbf16> to vector<1x16x16xbf16>
    %95 = vector.shape_cast %94 : vector<1x16x16xbf16> to vector<16x16xbf16>
    %96 = vector.extract_strided_slice %89 {offsets = [16, 0], sizes = [16, 64], strides = [1, 1]} : vector<128x64xbf16> to vector<16x64xbf16>
    %cst_33 = arith.constant dense<0.000000e+00> : vector<16x64xf32>
    %97 = tpu.matmul %95, %96, %cst_33 {dimension_numbers = #tpu.dot_dimension_numbers<[1], [0], [0], [1], [0, 0, 1, 1], [], []>} : vector<16x16xbf16>, vector<16x64xbf16>, vector<16x64xf32> -> vector<16x64xf32>
    %98 = vector.extract_strided_slice %0 {offsets = [2, 0, 0], sizes = [1, 16, 16], strides = [1, 1, 1]} : vector<8x16x16xbf16> to vector<1x16x16xbf16>
    %99 = vector.shape_cast %98 : vector<1x16x16xbf16> to vector<16x16xbf16>
    %100 = vector.extract_strided_slice %89 {offsets = [32, 0], sizes = [16, 64], strides = [1, 1]} : vector<128x64xbf16> to vector<16x64xbf16>
    %cst_34 = arith.constant dense<0.000000e+00> : vector<16x64xf32>
    %101 = tpu.matmul %99, %100, %cst_34 {dimension_numbers = #tpu.dot_dimension_numbers<[1], [0], [0], [1], [0, 0, 1, 1], [], []>} : vector<16x16xbf16>, vector<16x64xbf16>, vector<16x64xf32> -> vector<16x64xf32>
    %102 = vector.extract_strided_slice %0 {offsets = [3, 0, 0], sizes = [1, 16, 16], strides = [1, 1, 1]} : vector<8x16x16xbf16> to vector<1x16x16xbf16>
    %103 = vector.shape_cast %102 : vector<1x16x16xbf16> to vector<16x16xbf16>
    %104 = vector.extract_strided_slice %89 {offsets = [48, 0], sizes = [16, 64], strides = [1, 1]} : vector<128x64xbf16> to vector<16x64xbf16>
    %cst_35 = arith.constant dense<0.000000e+00> : vector<16x64xf32>
    %105 = tpu.matmul %103, %104, %cst_35 {dimension_numbers = #tpu.dot_dimension_numbers<[1], [0], [0], [1], [0, 0, 1, 1], [], []>} : vector<16x16xbf16>, vector<16x64xbf16>, vector<16x64xf32> -> vector<16x64xf32>
    %106 = vector.extract_strided_slice %0 {offsets = [4, 0, 0], sizes = [1, 16, 16], strides = [1, 1, 1]} : vector<8x16x16xbf16> to vector<1x16x16xbf16>
    %107 = vector.shape_cast %106 : vector<1x16x16xbf16> to vector<16x16xbf16>
    %108 = vector.extract_strided_slice %89 {offsets = [64, 0], sizes = [16, 64], strides = [1, 1]} : vector<128x64xbf16> to vector<16x64xbf16>
    %cst_36 = arith.constant dense<0.000000e+00> : vector<16x64xf32>
    %109 = tpu.matmul %107, %108, %cst_36 {dimension_numbers = #tpu.dot_dimension_numbers<[1], [0], [0], [1], [0, 0, 1, 1], [], []>} : vector<16x16xbf16>, vector<16x64xbf16>, vector<16x64xf32> -> vector<16x64xf32>
    %110 = vector.extract_strided_slice %0 {offsets = [5, 0, 0], sizes = [1, 16, 16], strides = [1, 1, 1]} : vector<8x16x16xbf16> to vector<1x16x16xbf16>
    %111 = vector.shape_cast %110 : vector<1x16x16xbf16> to vector<16x16xbf16>
    %112 = vector.extract_strided_slice %89 {offsets = [80, 0], sizes = [16, 64], strides = [1, 1]} : vector<128x64xbf16> to vector<16x64xbf16>
    %cst_37 = arith.constant dense<0.000000e+00> : vector<16x64xf32>
    %113 = tpu.matmul %111, %112, %cst_37 {dimension_numbers = #tpu.dot_dimension_numbers<[1], [0], [0], [1], [0, 0, 1, 1], [], []>} : vector<16x16xbf16>, vector<16x64xbf16>, vector<16x64xf32> -> vector<16x64xf32>
    %114 = vector.extract_strided_slice %0 {offsets = [6, 0, 0], sizes = [1, 16, 16], strides = [1, 1, 1]} : vector<8x16x16xbf16> to vector<1x16x16xbf16>
    %115 = vector.shape_cast %114 : vector<1x16x16xbf16> to vector<16x16xbf16>
    %116 = vector.extract_strided_slice %89 {offsets = [96, 0], sizes = [16, 64], strides = [1, 1]} : vector<128x64xbf16> to vector<16x64xbf16>
    %cst_38 = arith.constant dense<0.000000e+00> : vector<16x64xf32>
    %117 = tpu.matmul %115, %116, %cst_38 {dimension_numbers = #tpu.dot_dimension_numbers<[1], [0], [0], [1], [0, 0, 1, 1], [], []>} : vector<16x16xbf16>, vector<16x64xbf16>, vector<16x64xf32> -> vector<16x64xf32>
    %118 = vector.extract_strided_slice %0 {offsets = [7, 0, 0], sizes = [1, 16, 16], strides = [1, 1, 1]} : vector<8x16x16xbf16> to vector<1x16x16xbf16>
    %119 = vector.shape_cast %118 : vector<1x16x16xbf16> to vector<16x16xbf16>
    %120 = vector.extract_strided_slice %89 {offsets = [112, 0], sizes = [16, 64], strides = [1, 1]} : vector<128x64xbf16> to vector<16x64xbf16>
    %cst_39 = arith.constant dense<0.000000e+00> : vector<16x64xf32>
    %121 = tpu.matmul %119, %120, %cst_39 {dimension_numbers = #tpu.dot_dimension_numbers<[1], [0], [0], [1], [0, 0, 1, 1], [], []>} : vector<16x16xbf16>, vector<16x64xbf16>, vector<16x64xf32> -> vector<16x64xf32>
    %122 = tpu.concatenate %93, %97, %101, %105, %109, %113, %117, %121 in 0 : vector<16x64xf32>, vector<16x64xf32>, vector<16x64xf32>, vector<16x64xf32>, vector<16x64xf32>, vector<16x64xf32>, vector<16x64xf32>, vector<16x64xf32> -> vector<128x64xf32>
    %123 = arith.truncf %122 : vector<128x64xf32> to vector<128x64xbf16>
    %c0_40 = arith.constant 0 : index
    %c0_41 = arith.constant 0 : index
    %124 = vector.load %arg7[%c0_40, %c0_41] : memref<64x96xf32, #tpu.memory_space<vmem>>, vector<64x96xf32>
    %125 = arith.truncf %124 : vector<64x96xf32> to vector<64x96xbf16>
    %cst_42 = arith.constant dense<0.000000e+00> : vector<128x96xf32>
    %126 = tpu.matmul %123, %125, %cst_42 {dimension_numbers = #tpu.dot_dimension_numbers<[1], [0], [0], [1], [0, 0, 1, 1], [], []>} : vector<128x64xbf16>, vector<64x96xbf16>, vector<128x96xf32> -> vector<128x96xf32>
    %c0_43 = arith.constant 0 : index
    %c0_44 = arith.constant 0 : index
    %127 = vector.load %arg8[%c0_43, %c0_44] : memref<1x96xf32, #tpu.memory_space<vmem>>, vector<1x96xf32>
    %128 = vector.broadcast %127 : vector<1x96xf32> to vector<128x96xf32>
    %129 = arith.addf %126, %128 : vector<128x96xf32>
    %cst_45 = arith.constant 0.000000e+00 : f32
    %130 = vector.broadcast %cst_45 : f32 to vector<128x96xf32>
    %131 = arith.maximumf %129, %130 : vector<128x96xf32>
    %132 = arith.truncf %131 : vector<128x96xf32> to vector<128x96xbf16>
    %c0_46 = arith.constant 0 : index
    %c0_47 = arith.constant 0 : index
    %133 = vector.load %arg9[%c0_46, %c0_47] : memref<96x64xf32, #tpu.memory_space<vmem>>, vector<96x64xf32>
    %134 = arith.truncf %133 : vector<96x64xf32> to vector<96x64xbf16>
    %cst_48 = arith.constant dense<0.000000e+00> : vector<128x64xf32>
    %135 = tpu.matmul %132, %134, %cst_48 {dimension_numbers = #tpu.dot_dimension_numbers<[1], [0], [0], [1], [0, 0, 1, 1], [], []>} : vector<128x96xbf16>, vector<96x64xbf16>, vector<128x64xf32> -> vector<128x64xf32>
    %136 = arith.truncf %135 : vector<128x64xf32> to vector<128x64xbf16>
    %137 = vector.extract_strided_slice %0 {offsets = [0, 0, 0], sizes = [1, 16, 16], strides = [1, 1, 1]} : vector<8x16x16xbf16> to vector<1x16x16xbf16>
    %138 = vector.shape_cast %137 : vector<1x16x16xbf16> to vector<16x16xbf16>
    %139 = vector.extract_strided_slice %136 {offsets = [0, 0], sizes = [16, 64], strides = [1, 1]} : vector<128x64xbf16> to vector<16x64xbf16>
    %cst_49 = arith.constant dense<0.000000e+00> : vector<16x64xf32>
    %140 = tpu.matmul %138, %139, %cst_49 {dimension_numbers = #tpu.dot_dimension_numbers<[1], [0], [0], [1], [0, 0, 1, 1], [], []>} : vector<16x16xbf16>, vector<16x64xbf16>, vector<16x64xf32> -> vector<16x64xf32>
    %141 = vector.extract_strided_slice %0 {offsets = [1, 0, 0], sizes = [1, 16, 16], strides = [1, 1, 1]} : vector<8x16x16xbf16> to vector<1x16x16xbf16>
    %142 = vector.shape_cast %141 : vector<1x16x16xbf16> to vector<16x16xbf16>
    %143 = vector.extract_strided_slice %136 {offsets = [16, 0], sizes = [16, 64], strides = [1, 1]} : vector<128x64xbf16> to vector<16x64xbf16>
    %cst_50 = arith.constant dense<0.000000e+00> : vector<16x64xf32>
    %144 = tpu.matmul %142, %143, %cst_50 {dimension_numbers = #tpu.dot_dimension_numbers<[1], [0], [0], [1], [0, 0, 1, 1], [], []>} : vector<16x16xbf16>, vector<16x64xbf16>, vector<16x64xf32> -> vector<16x64xf32>
    %145 = vector.extract_strided_slice %0 {offsets = [2, 0, 0], sizes = [1, 16, 16], strides = [1, 1, 1]} : vector<8x16x16xbf16> to vector<1x16x16xbf16>
    %146 = vector.shape_cast %145 : vector<1x16x16xbf16> to vector<16x16xbf16>
    %147 = vector.extract_strided_slice %136 {offsets = [32, 0], sizes = [16, 64], strides = [1, 1]} : vector<128x64xbf16> to vector<16x64xbf16>
    %cst_51 = arith.constant dense<0.000000e+00> : vector<16x64xf32>
    %148 = tpu.matmul %146, %147, %cst_51 {dimension_numbers = #tpu.dot_dimension_numbers<[1], [0], [0], [1], [0, 0, 1, 1], [], []>} : vector<16x16xbf16>, vector<16x64xbf16>, vector<16x64xf32> -> vector<16x64xf32>
    %149 = vector.extract_strided_slice %0 {offsets = [3, 0, 0], sizes = [1, 16, 16], strides = [1, 1, 1]} : vector<8x16x16xbf16> to vector<1x16x16xbf16>
    %150 = vector.shape_cast %149 : vector<1x16x16xbf16> to vector<16x16xbf16>
    %151 = vector.extract_strided_slice %136 {offsets = [48, 0], sizes = [16, 64], strides = [1, 1]} : vector<128x64xbf16> to vector<16x64xbf16>
    %cst_52 = arith.constant dense<0.000000e+00> : vector<16x64xf32>
    %152 = tpu.matmul %150, %151, %cst_52 {dimension_numbers = #tpu.dot_dimension_numbers<[1], [0], [0], [1], [0, 0, 1, 1], [], []>} : vector<16x16xbf16>, vector<16x64xbf16>, vector<16x64xf32> -> vector<16x64xf32>
    %153 = vector.extract_strided_slice %0 {offsets = [4, 0, 0], sizes = [1, 16, 16], strides = [1, 1, 1]} : vector<8x16x16xbf16> to vector<1x16x16xbf16>
    %154 = vector.shape_cast %153 : vector<1x16x16xbf16> to vector<16x16xbf16>
    %155 = vector.extract_strided_slice %136 {offsets = [64, 0], sizes = [16, 64], strides = [1, 1]} : vector<128x64xbf16> to vector<16x64xbf16>
    %cst_53 = arith.constant dense<0.000000e+00> : vector<16x64xf32>
    %156 = tpu.matmul %154, %155, %cst_53 {dimension_numbers = #tpu.dot_dimension_numbers<[1], [0], [0], [1], [0, 0, 1, 1], [], []>} : vector<16x16xbf16>, vector<16x64xbf16>, vector<16x64xf32> -> vector<16x64xf32>
    %157 = vector.extract_strided_slice %0 {offsets = [5, 0, 0], sizes = [1, 16, 16], strides = [1, 1, 1]} : vector<8x16x16xbf16> to vector<1x16x16xbf16>
    %158 = vector.shape_cast %157 : vector<1x16x16xbf16> to vector<16x16xbf16>
    %159 = vector.extract_strided_slice %136 {offsets = [80, 0], sizes = [16, 64], strides = [1, 1]} : vector<128x64xbf16> to vector<16x64xbf16>
    %cst_54 = arith.constant dense<0.000000e+00> : vector<16x64xf32>
    %160 = tpu.matmul %158, %159, %cst_54 {dimension_numbers = #tpu.dot_dimension_numbers<[1], [0], [0], [1], [0, 0, 1, 1], [], []>} : vector<16x16xbf16>, vector<16x64xbf16>, vector<16x64xf32> -> vector<16x64xf32>
    %161 = vector.extract_strided_slice %0 {offsets = [6, 0, 0], sizes = [1, 16, 16], strides = [1, 1, 1]} : vector<8x16x16xbf16> to vector<1x16x16xbf16>
    %162 = vector.shape_cast %161 : vector<1x16x16xbf16> to vector<16x16xbf16>
    %163 = vector.extract_strided_slice %136 {offsets = [96, 0], sizes = [16, 64], strides = [1, 1]} : vector<128x64xbf16> to vector<16x64xbf16>
    %cst_55 = arith.constant dense<0.000000e+00> : vector<16x64xf32>
    %164 = tpu.matmul %162, %163, %cst_55 {dimension_numbers = #tpu.dot_dimension_numbers<[1], [0], [0], [1], [0, 0, 1, 1], [], []>} : vector<16x16xbf16>, vector<16x64xbf16>, vector<16x64xf32> -> vector<16x64xf32>
    %165 = vector.extract_strided_slice %0 {offsets = [7, 0, 0], sizes = [1, 16, 16], strides = [1, 1, 1]} : vector<8x16x16xbf16> to vector<1x16x16xbf16>
    %166 = vector.shape_cast %165 : vector<1x16x16xbf16> to vector<16x16xbf16>
    %167 = vector.extract_strided_slice %136 {offsets = [112, 0], sizes = [16, 64], strides = [1, 1]} : vector<128x64xbf16> to vector<16x64xbf16>
    %cst_56 = arith.constant dense<0.000000e+00> : vector<16x64xf32>
    %168 = tpu.matmul %166, %167, %cst_56 {dimension_numbers = #tpu.dot_dimension_numbers<[1], [0], [0], [1], [0, 0, 1, 1], [], []>} : vector<16x16xbf16>, vector<16x64xbf16>, vector<16x64xf32> -> vector<16x64xf32>
    %169 = tpu.concatenate %140, %144, %148, %152, %156, %160, %164, %168 in 0 : vector<16x64xf32>, vector<16x64xf32>, vector<16x64xf32>, vector<16x64xf32>, vector<16x64xf32>, vector<16x64xf32>, vector<16x64xf32>, vector<16x64xf32> -> vector<128x64xf32>
    %c0_57 = arith.constant 0 : index
    %c0_58 = arith.constant 0 : index
    %170 = vector.load %arg10[%c0_57, %c0_58] : memref<1x64xf32, #tpu.memory_space<vmem>>, vector<1x64xf32>
    %171 = vector.broadcast %170 : vector<1x64xf32> to vector<128x64xf32>
    %172 = arith.addf %169, %171 : vector<128x64xf32>
    %cst_59 = arith.constant 0.000000e+00 : f32
    %173 = vector.broadcast %cst_59 : f32 to vector<128x64xf32>
    %174 = arith.maximumf %172, %173 : vector<128x64xf32>
    %175 = arith.truncf %174 : vector<128x64xf32> to vector<128x64xbf16>
    %c0_60 = arith.constant 0 : index
    %c0_61 = arith.constant 0 : index
    %176 = vector.load %arg11[%c0_60, %c0_61] : memref<64x32xf32, #tpu.memory_space<vmem>>, vector<64x32xf32>
    %177 = arith.truncf %176 : vector<64x32xf32> to vector<64x32xbf16>
    %cst_62 = arith.constant dense<0.000000e+00> : vector<128x32xf32>
    %178 = tpu.matmul %175, %177, %cst_62 {dimension_numbers = #tpu.dot_dimension_numbers<[1], [0], [0], [1], [0, 0, 1, 1], [], []>} : vector<128x64xbf16>, vector<64x32xbf16>, vector<128x32xf32> -> vector<128x32xf32>
    %179 = arith.truncf %178 : vector<128x32xf32> to vector<128x32xbf16>
    %180 = vector.extract_strided_slice %0 {offsets = [0, 0, 0], sizes = [1, 16, 16], strides = [1, 1, 1]} : vector<8x16x16xbf16> to vector<1x16x16xbf16>
    %181 = vector.shape_cast %180 : vector<1x16x16xbf16> to vector<16x16xbf16>
    %182 = vector.extract_strided_slice %179 {offsets = [0, 0], sizes = [16, 32], strides = [1, 1]} : vector<128x32xbf16> to vector<16x32xbf16>
    %cst_63 = arith.constant dense<0.000000e+00> : vector<16x32xf32>
    %183 = tpu.matmul %181, %182, %cst_63 {dimension_numbers = #tpu.dot_dimension_numbers<[1], [0], [0], [1], [0, 0, 1, 1], [], []>} : vector<16x16xbf16>, vector<16x32xbf16>, vector<16x32xf32> -> vector<16x32xf32>
    %184 = vector.extract_strided_slice %0 {offsets = [1, 0, 0], sizes = [1, 16, 16], strides = [1, 1, 1]} : vector<8x16x16xbf16> to vector<1x16x16xbf16>
    %185 = vector.shape_cast %184 : vector<1x16x16xbf16> to vector<16x16xbf16>
    %186 = vector.extract_strided_slice %179 {offsets = [16, 0], sizes = [16, 32], strides = [1, 1]} : vector<128x32xbf16> to vector<16x32xbf16>
    %cst_64 = arith.constant dense<0.000000e+00> : vector<16x32xf32>
    %187 = tpu.matmul %185, %186, %cst_64 {dimension_numbers = #tpu.dot_dimension_numbers<[1], [0], [0], [1], [0, 0, 1, 1], [], []>} : vector<16x16xbf16>, vector<16x32xbf16>, vector<16x32xf32> -> vector<16x32xf32>
    %188 = vector.extract_strided_slice %0 {offsets = [2, 0, 0], sizes = [1, 16, 16], strides = [1, 1, 1]} : vector<8x16x16xbf16> to vector<1x16x16xbf16>
    %189 = vector.shape_cast %188 : vector<1x16x16xbf16> to vector<16x16xbf16>
    %190 = vector.extract_strided_slice %179 {offsets = [32, 0], sizes = [16, 32], strides = [1, 1]} : vector<128x32xbf16> to vector<16x32xbf16>
    %cst_65 = arith.constant dense<0.000000e+00> : vector<16x32xf32>
    %191 = tpu.matmul %189, %190, %cst_65 {dimension_numbers = #tpu.dot_dimension_numbers<[1], [0], [0], [1], [0, 0, 1, 1], [], []>} : vector<16x16xbf16>, vector<16x32xbf16>, vector<16x32xf32> -> vector<16x32xf32>
    %192 = vector.extract_strided_slice %0 {offsets = [3, 0, 0], sizes = [1, 16, 16], strides = [1, 1, 1]} : vector<8x16x16xbf16> to vector<1x16x16xbf16>
    %193 = vector.shape_cast %192 : vector<1x16x16xbf16> to vector<16x16xbf16>
    %194 = vector.extract_strided_slice %179 {offsets = [48, 0], sizes = [16, 32], strides = [1, 1]} : vector<128x32xbf16> to vector<16x32xbf16>
    %cst_66 = arith.constant dense<0.000000e+00> : vector<16x32xf32>
    %195 = tpu.matmul %193, %194, %cst_66 {dimension_numbers = #tpu.dot_dimension_numbers<[1], [0], [0], [1], [0, 0, 1, 1], [], []>} : vector<16x16xbf16>, vector<16x32xbf16>, vector<16x32xf32> -> vector<16x32xf32>
    %196 = vector.extract_strided_slice %0 {offsets = [4, 0, 0], sizes = [1, 16, 16], strides = [1, 1, 1]} : vector<8x16x16xbf16> to vector<1x16x16xbf16>
    %197 = vector.shape_cast %196 : vector<1x16x16xbf16> to vector<16x16xbf16>
    %198 = vector.extract_strided_slice %179 {offsets = [64, 0], sizes = [16, 32], strides = [1, 1]} : vector<128x32xbf16> to vector<16x32xbf16>
    %cst_67 = arith.constant dense<0.000000e+00> : vector<16x32xf32>
    %199 = tpu.matmul %197, %198, %cst_67 {dimension_numbers = #tpu.dot_dimension_numbers<[1], [0], [0], [1], [0, 0, 1, 1], [], []>} : vector<16x16xbf16>, vector<16x32xbf16>, vector<16x32xf32> -> vector<16x32xf32>
    %200 = vector.extract_strided_slice %0 {offsets = [5, 0, 0], sizes = [1, 16, 16], strides = [1, 1, 1]} : vector<8x16x16xbf16> to vector<1x16x16xbf16>
    %201 = vector.shape_cast %200 : vector<1x16x16xbf16> to vector<16x16xbf16>
    %202 = vector.extract_strided_slice %179 {offsets = [80, 0], sizes = [16, 32], strides = [1, 1]} : vector<128x32xbf16> to vector<16x32xbf16>
    %cst_68 = arith.constant dense<0.000000e+00> : vector<16x32xf32>
    %203 = tpu.matmul %201, %202, %cst_68 {dimension_numbers = #tpu.dot_dimension_numbers<[1], [0], [0], [1], [0, 0, 1, 1], [], []>} : vector<16x16xbf16>, vector<16x32xbf16>, vector<16x32xf32> -> vector<16x32xf32>
    %204 = vector.extract_strided_slice %0 {offsets = [6, 0, 0], sizes = [1, 16, 16], strides = [1, 1, 1]} : vector<8x16x16xbf16> to vector<1x16x16xbf16>
    %205 = vector.shape_cast %204 : vector<1x16x16xbf16> to vector<16x16xbf16>
    %206 = vector.extract_strided_slice %179 {offsets = [96, 0], sizes = [16, 32], strides = [1, 1]} : vector<128x32xbf16> to vector<16x32xbf16>
    %cst_69 = arith.constant dense<0.000000e+00> : vector<16x32xf32>
    %207 = tpu.matmul %205, %206, %cst_69 {dimension_numbers = #tpu.dot_dimension_numbers<[1], [0], [0], [1], [0, 0, 1, 1], [], []>} : vector<16x16xbf16>, vector<16x32xbf16>, vector<16x32xf32> -> vector<16x32xf32>
    %208 = vector.extract_strided_slice %0 {offsets = [7, 0, 0], sizes = [1, 16, 16], strides = [1, 1, 1]} : vector<8x16x16xbf16> to vector<1x16x16xbf16>
    %209 = vector.shape_cast %208 : vector<1x16x16xbf16> to vector<16x16xbf16>
    %210 = vector.extract_strided_slice %179 {offsets = [112, 0], sizes = [16, 32], strides = [1, 1]} : vector<128x32xbf16> to vector<16x32xbf16>
    %cst_70 = arith.constant dense<0.000000e+00> : vector<16x32xf32>
    %211 = tpu.matmul %209, %210, %cst_70 {dimension_numbers = #tpu.dot_dimension_numbers<[1], [0], [0], [1], [0, 0, 1, 1], [], []>} : vector<16x16xbf16>, vector<16x32xbf16>, vector<16x32xf32> -> vector<16x32xf32>
    %212 = tpu.concatenate %183, %187, %191, %195, %199, %203, %207, %211 in 0 : vector<16x32xf32>, vector<16x32xf32>, vector<16x32xf32>, vector<16x32xf32>, vector<16x32xf32>, vector<16x32xf32>, vector<16x32xf32>, vector<16x32xf32> -> vector<128x32xf32>
    %c0_71 = arith.constant 0 : index
    %c0_72 = arith.constant 0 : index
    %213 = vector.load %arg12[%c0_71, %c0_72] : memref<1x32xf32, #tpu.memory_space<vmem>>, vector<1x32xf32>
    %214 = vector.broadcast %213 : vector<1x32xf32> to vector<128x32xf32>
    %215 = arith.addf %212, %214 : vector<128x32xf32>
    %216 = vector.shape_cast %215 : vector<128x32xf32> to vector<8x16x32xf32>
    %cst_73 = arith.constant dense<0xFF800000> : vector<8x32xf32>
    %217 = vector.multi_reduction <maximumf>, %216, %cst_73 [1] : vector<8x16x32xf32> to vector<8x32xf32>
    %218 = arith.truncf %217 : vector<8x32xf32> to vector<8x32xbf16>
    %c0_74 = arith.constant 0 : index
    %c0_75 = arith.constant 0 : index
    %219 = vector.load %arg13[%c0_74, %c0_75] : memref<32x4xf32, #tpu.memory_space<vmem>>, vector<32x4xf32>
    %220 = arith.truncf %219 : vector<32x4xf32> to vector<32x4xbf16>
    %cst_76 = arith.constant dense<0.000000e+00> : vector<8x4xf32>
    %221 = tpu.matmul %218, %220, %cst_76 {dimension_numbers = #tpu.dot_dimension_numbers<[1], [0], [0], [1], [0, 0, 1, 1], [], []>} : vector<8x32xbf16>, vector<32x4xbf16>, vector<8x4xf32> -> vector<8x4xf32>
    %c0_77 = arith.constant 0 : index
    %c0_78 = arith.constant 0 : index
    %222 = vector.load %arg14[%c0_77, %c0_78] : memref<1x4xf32, #tpu.memory_space<vmem>>, vector<1x4xf32>
    %223 = vector.broadcast %222 : vector<1x4xf32> to vector<8x4xf32>
    %224 = arith.addf %221, %223 : vector<8x4xf32>
    %c0_79 = arith.constant 0 : index
    %c0_80 = arith.constant 0 : index
    %225 = vector.load %arg15[%c0_79, %c0_80] : memref<8x4xf32, #tpu.memory_space<vmem>>, vector<8x4xf32>
    tpu.vector_store %arg15[%c0_79, %c0_80], %224 {strides = array<i32>} : memref<8x4xf32, #tpu.memory_space<vmem>>, vector<8x4xf32>,
    return
  }
  func.func @transform_0(%arg0: i32) -> (i32, i32, i32) {
    %c0_i32 = arith.constant 0 : i32
    %c0_i32_0 = arith.constant 0 : i32
    %c0_i32_1 = arith.constant 0 : i32
    return %arg0, %c0_i32, %c0_i32_0 : i32, i32, i32
  }
  func.func @transform_1(%arg0: i32) -> (i32, i32, i32) {
    %c0_i32 = arith.constant 0 : i32
    %c0_i32_0 = arith.constant 0 : i32
    %c0_i32_1 = arith.constant 0 : i32
    return %arg0, %c0_i32, %c0_i32_0 : i32, i32, i32
  }
  func.func @transform_2(%arg0: i32) -> (i32, i32) {
    %c0_i32 = arith.constant 0 : i32
    %c0_i32_0 = arith.constant 0 : i32
    %c0_i32_1 = arith.constant 0 : i32
    return %c0_i32, %c0_i32_0 : i32, i32
  }
  func.func @transform_3(%arg0: i32) -> (i32, i32) {
    %c0_i32 = arith.constant 0 : i32
    %c0_i32_0 = arith.constant 0 : i32
    %c0_i32_1 = arith.constant 0 : i32
    return %c0_i32, %c0_i32_0 : i32, i32
  }
  func.func @transform_4(%arg0: i32) -> (i32, i32) {
    %c0_i32 = arith.constant 0 : i32
    %c0_i32_0 = arith.constant 0 : i32
    %c0_i32_1 = arith.constant 0 : i32
    return %c0_i32, %c0_i32_0 : i32, i32
  }
  func.func @transform_5(%arg0: i32) -> (i32, i32) {
    %c0_i32 = arith.constant 0 : i32
    %c0_i32_0 = arith.constant 0 : i32
    %c0_i32_1 = arith.constant 0 : i32
    return %c0_i32, %c0_i32_0 : i32, i32
  }
  func.func @transform_6(%arg0: i32) -> (i32, i32) {
    %c0_i32 = arith.constant 0 : i32
    %c0_i32_0 = arith.constant 0 : i32
    %c0_i32_1 = arith.constant 0 : i32
    return %c0_i32, %c0_i32_0 : i32, i32
  }
  func.func @transform_7(%arg0: i32) -> (i32, i32) {
    %c0_i32 = arith.constant 0 : i32
    %c0_i32_0 = arith.constant 0 : i32
    %c0_i32_1 = arith.constant 0 : i32
    return %c0_i32, %c0_i32_0 : i32, i32
  }
  func.func @transform_8(%arg0: i32) -> (i32, i32) {
    %c0_i32 = arith.constant 0 : i32
    %c0_i32_0 = arith.constant 0 : i32
    %c0_i32_1 = arith.constant 0 : i32
    return %c0_i32, %c0_i32_0 : i32, i32
  }
  func.func @transform_9(%arg0: i32) -> (i32, i32) {
    %c0_i32 = arith.constant 0 : i32
    %c0_i32_0 = arith.constant 0 : i32
    %c0_i32_1 = arith.constant 0 : i32
    return %c0_i32, %c0_i32_0 : i32, i32
  }
  func.func @transform_10(%arg0: i32) -> (i32, i32) {
    %c0_i32 = arith.constant 0 : i32
    %c0_i32_0 = arith.constant 0 : i32
    %c0_i32_1 = arith.constant 0 : i32
    return %c0_i32, %c0_i32_0 : i32, i32
  }
  func.func @transform_11(%arg0: i32) -> (i32, i32) {
    %c0_i32 = arith.constant 0 : i32
    %c0_i32_0 = arith.constant 0 : i32
    %c0_i32_1 = arith.constant 0 : i32
    return %c0_i32, %c0_i32_0 : i32, i32
  }
  func.func @transform_12(%arg0: i32) -> (i32, i32) {
    %c0_i32 = arith.constant 0 : i32
    %c0_i32_0 = arith.constant 0 : i32
    %c0_i32_1 = arith.constant 0 : i32
    return %c0_i32, %c0_i32_0 : i32, i32
  }
  func.func @transform_13(%arg0: i32) -> (i32, i32) {
    %c0_i32 = arith.constant 0 : i32
    %c0_i32_0 = arith.constant 0 : i32
    %c0_i32_1 = arith.constant 0 : i32
    return %c0_i32, %c0_i32_0 : i32, i32
  }
  func.func @transform_14(%arg0: i32) -> (i32, i32) {
    %c0_i32 = arith.constant 0 : i32
    %c0_i32_0 = arith.constant 0 : i32
    return %arg0, %c0_i32 : i32, i32
  }
}

</mosaic_0001>

<bundles_post_ra>
// kernel: tpu_custom_call.1
= control target key start
LH: loop header
LB: loop body
LE: loop exit
PB: predicated region body
PF: predicated region fallthrough
CT: control target
= control target key end

     0   :  { %s4067_s29 = smov 0   ;;  %s4622_s0 = inlined_call_operand.vmem [shape: bf16[16,16,16], index: 0, kind: input, shape index: {}]   ;;  %s4623_s1 = inlined_call_operand.vmem [shape: f32[16,16,8], index: 1, kind: input, shape index: {}]   ;;  %s4624_s2 = inlined_call_operand.vmem [shape: f32[8,32], index: 2, kind: input, shape index: {}]   ;;  %s4625_s3 = inlined_call_operand.vmem [shape: f32[1,32], index: 3, kind: input, shape index: {}]   ;;  %s4626_s4 = inlined_call_operand.vmem [shape: f32[32,64], index: 4, kind: input, shape index: {}]   ;;  %s4627_s5 = inlined_call_operand.vmem [shape: f32[1,64], index: 5, kind: input, shape index: {}]   ;;  %s4628_s6 = inlined_call_operand.vmem [shape: f32[64,96], index: 6, kind: input, shape index: {}]   ;;  %s4629_s7 = inlined_call_operand.vmem [shape: f32[1,96], index: 7, kind: input, shape index: {}]   ;;  %s4630_s8 = inlined_call_operand.vmem [shape: f32[96,64], index: 8, kind: input, shape index: {}]   ;;  %s4631_s9 = inlined_call_operand.vmem [shape: f32[1,64], index: 9, kind: input, shape index: {}]   ;;  %s4632_s10 = inlined_call_operand.vmem [shape: f32[64,32], index: 10, kind: input, shape index: {}]   ;;  %s4633_s11 = inlined_call_operand.vmem [shape: f32[1,32], index: 11, kind: input, shape index: {}]   ;;  %s4634_s12 = inlined_call_operand.vmem [shape: f32[32,4], index: 12, kind: input, shape index: {}]   ;;  %s4635_s13 = inlined_call_operand.vmem [shape: f32[1,4], index: 13, kind: input, shape index: {}]   ;;  %s4636_s14 = inlined_call_operand.vmem [shape: f32[16,4], index: 14, kind: output, shape index: {}]  }
   0x1 LB: > { %s4073_s30 = sadd.s32 4294967295, %s3988_s29   ;;  %p3346_p0 = scmp.ge.s32.totalorder %s3988_s29, 1  ;;  %s3988_s29 = sphi %s4067_s29, %s24_s29  }
   0x2   : > { %p426_p1 = scmp.lt.s32.totalorder %s3988_s29, 3 }
   0x4   : > { %p427_p2 = pnand %p3346_p0, %p426_p1 }
   0x5   : > { %s3347_s15 = sshll.u32 (!%p427_p2), %s4073_s30, 3  ;;  %v3990_v0 = vmov (!%p427_p2), 0.0   ;;  %vm3991_vm0 = vmmov (!%p427_p2), 0   ;;  %vm542_vm1 = vcmask (!%p427_p2), 130048   ;;  %v938_v33 = vld [vmem:[%s4624_s2] sm:$0xff] (!%p427_p2)  ;;  %vm972_vm2 = vcmask (!%p427_p2), 1043456  }
   0x6   : > { %430 = sbr.rel (%p427_p2) target bundleno = 2519 (0x9d7), region = 76  ;;  %3593 = vmatprep.subr.bf16.mxu0 (!%p427_p2), %v3990_v0  ;;  %3599 = vmatprep.subr.bf16.mxu1 (!%p427_p2), %v3990_v0  ;;  %p479_p3 = scmp.lt.s32.totalorder (!%p427_p2), %s3347_s15, 15  ;;  %v939_v34 = vpack.c.bf16 (!%p427_p2), %v938_v33, %v938_v33  ;;  %vm947_vm3 = vcmask (!%p427_p2), 64512   ;;  %vm1446_vm4 = vcmask (!%p427_p2), 261120   ;;  %vm1947_vm5 = vcmask (!%p427_p2), 523264  }
   0x7   : > { %3595 = vmatprep.mubr.msk.bf16.mxu0 (!%p427_p2), %vm3991_vm0, %v3990_v0  ;;  %3601 = vmatprep.mubr.msk.bf16.mxu1 (!%p427_p2), %vm3991_vm0, %v3990_v0  ;;  %vm2111_vm6 = vcmask (!%p427_p2), 785408   ;;  %vm3217_vm7 = vcmask (!%p427_p2), 1041409   ;;  %vm3219_vm8 = vcmask (!%p427_p2), 1042434   ;;  %vm3221_vm9 = vcmask (!%p427_p2), 1043459   ;;  %p492_p4 = scmp.lt.s32.totalorder (!%p427_p2), %s4073_s30, 1 }
   0x8   : > { %v974_v35 = vsel (!%p427_p2), %vm972_vm2, %v939_v34, 0  ;;  %vm3223_vm10 = vcmask (!%p427_p2), 1044484   ;;  %vm3225_vm11 = vcmask (!%p427_p2), 1045509   ;;  %vm3227_vm12 = vcmask (!%p427_p2), 1046534  }
   0x9   : > { %vm3229_vm13 = vcmask (!%p427_p2), 1047559   ;;  %vm3275_vm14 = vcmask (!%p427_p2), 31744  }
   0xd   : > { %s4638_s15 = smov (!%p479_p3, %s3347_s15), 15  ;;  %s4640_s30 = smov (!%p492_p4, %s4073_s30), 1 }
   0xe   : > { %s3451_s16 = sshll.u32 %s4638_s15, 3  ;;  %s3452_s17 = sshll.u32 %s4638_s15, 4 }
   0xf   : > { %s4087_s20 = scalar_lea.vmem %s4622_s0, %s3451_s16  ;;  %s4092_s23 = scalar_lea.vmem %s4623_s1, %s3452_s17 }
  0x10   : > { %v513_v1 = vld [vmem:[%s4092_s23] sm:$0xff]  ;;  %v514_v2 = vld [vmem:[%s4092_s23 + $0x8] sm:$0xff]  ;;  %v515_v3 = vld [vmem:[%s4092_s23 + $0x10] sm:$0xff]  ;;  %s3353_s28 = sshll.u32 %s4640_s30, 3 }
  0x11   : > { %v529_v4 = vpack.c.bf16 %v514_v2, %v513_v1  ;;  %v516_v5 = vld [vmem:[%s4092_s23 + $0x18] sm:$0xff]  ;;  %v4099_v7 = vld [vmem:[%s4087_s20] sm:$0xff]   ;;  %v4102_v8 = vld [vmem:[%s4087_s20 + $0x8] sm:$0xff]   ;;  %s495_s19 = scalar_lea.vmem %s4636_s14, %s3353_s28 }
  0x12   : > { %v530_v6 = vpack.c.bf16 %v516_v5, %v515_v3  ;;  %v517_v9 = vld [vmem:[%s4092_s23 + $0x20] sm:$0xff]  ;;  %v518_v10 = vld [vmem:[%s4092_s23 + $0x28] sm:$0xff]  ;;  %v519_v12 = vld [vmem:[%s4092_s23 + $0x30] sm:$0xff] }
  0x13   : > { %3594 = vmatpush3.bf16.msra.mxu0 %v529_v4  ;;  %v531_v11 = vpack.c.bf16 %v518_v10, %v517_v9  ;;  %v520_v13 = vld [vmem:[%s4092_s23 + $0x38] sm:$0xff]  ;;  %v521_v15 = vld [vmem:[%s4092_s23 + $0x40] sm:$0xff]  ;;  %v522_v16 = vld [vmem:[%s4092_s23 + $0x48] sm:$0xff] }
  0x14   : > { %3600 = vmatpush3.bf16.msra.mxu1 %v530_v6  ;;  %3605 = vmatprep.subr.bf16.mxu0 %v3990_v0  ;;  %v532_v14 = vpack.c.bf16 %v520_v13, %v519_v12  ;;  %v523_v17 = vld [vmem:[%s4092_s23 + $0x50] sm:$0xff]  ;;  %v524_v18 = vld [vmem:[%s4092_s23 + $0x58] sm:$0xff]  ;;  %v533_v21 = vpack.c.bf16 %v522_v16, %v521_v15  ;;  %v525_v23 = vld [vmem:[%s4092_s23 + $0x60] sm:$0xff] }
  0x15   : > { %3611 = vmatprep.subr.bf16.mxu1 %v3990_v0  ;;  %v4124_v19 = vld [vmem:[%s4087_s20 + $0x10] sm:$0xff]   ;;  %v4128_v20 = vld [vmem:[%s4087_s20 + $0x18] sm:$0xff]   ;;  %v534_v22 = vpack.c.bf16 %v524_v18, %v523_v17  ;;  %v526_v24 = vld [vmem:[%s4092_s23 + $0x68] sm:$0xff] }
  0x16   : > { %3596 = vmatmul.mubr.msk.bf16.vlgmr.msra.gmra.mrb[0].mxu0 %vm542_vm1, %v4099_v7  ;;  %v527_v25 = vld [vmem:[%s4092_s23 + $0x70] sm:$0xff]  ;;  %v528_v26 = vld [vmem:[%s4092_s23 + $0x78] sm:$0xff]  ;;  %v4144_v27 = vld [vmem:[%s4087_s20 + $0x20] sm:$0xff]   ;;  %v535_v29 = vpack.c.bf16 %v526_v24, %v525_v23 }
  0x17   : > { %3602 = vmatmul.mubr.msk.bf16.vlgmr.msra.gmra.mrb[0].mxu1 %vm542_vm1, %v4102_v8  ;;  %3606 = vmatpush3.bf16.msra.mxu0 %v531_v11  ;;  %v4148_v28 = vld [vmem:[%s4087_s20 + $0x28] sm:$0xff]   ;;  %v536_v30 = vpack.c.bf16 %v528_v26, %v527_v25  ;;  %v4160_v31 = vld [vmem:[%s4087_s20 + $0x30] sm:$0xff]   ;;  %v4163_v32 = vld [vmem:[%s4087_s20 + $0x38] sm:$0xff]  }
  0x18   : > { %3612 = vmatpush3.bf16.msra.mxu1 %v532_v14  ;;  %3607 = vmatprep.mubr.msk.bf16.mxu0 %vm3991_vm0, %v3990_v0  ;;  %v4188_v15 = vld [vmem:[%s4625_s3] ss:$0 sm:$0xff] }
  0x19   : > { %3613 = vmatprep.mubr.msk.bf16.mxu1 %vm3991_vm0, %v3990_v0  ;;  %3617 = vmatprep.subr.bf16.mxu0 %v3990_v0 }
  0x1a   : > { %3623 = vmatprep.subr.bf16.mxu1 %v3990_v0 }
  0x1e   : > { %3608 = vmatmul.mubr.msk.bf16.vlgmr.msra.gmra.mrb[4].mxu0 %vm542_vm1, %v4124_v19 }
  0x1f   : > { %3614 = vmatmul.mubr.msk.bf16.vlgmr.msra.gmra.mrb[4].mxu1 %vm542_vm1, %v4128_v20  ;;  %3618 = vmatpush3.bf16.msra.mxu0 %v533_v21 }
  0x20   : > { %3624 = vmatpush3.bf16.msra.mxu1 %v534_v22  ;;  %3619 = vmatprep.mubr.msk.bf16.mxu0 %vm3991_vm0, %v3990_v0 }
  0x21   : > { %3625 = vmatprep.mubr.msk.bf16.mxu1 %vm3991_vm0, %v3990_v0  ;;  %3629 = vmatprep.subr.bf16.mxu0 %v3990_v0 }
  0x22   : > { %3635 = vmatprep.subr.bf16.mxu1 %v3990_v0 }
  0x26   : > { %3620 = vmatmul.mubr.msk.bf16.vlgmr.msra.gmra.mrb[8].mxu0 %vm542_vm1, %v4144_v27 }
  0x27   : > { %3626 = vmatmul.mubr.msk.bf16.vlgmr.msra.gmra.mrb[8].mxu1 %vm542_vm1, %v4148_v28  ;;  %3630 = vmatpush3.bf16.msra.mxu0 %v535_v29 }
  0x28   : > { %3636 = vmatpush3.bf16.msra.mxu1 %v536_v30  ;;  %3631 = vmatprep.mubr.msk.bf16.mxu0 %vm3991_vm0, %v3990_v0 }
  0x29   : > { %3637 = vmatprep.mubr.msk.bf16.mxu1 %vm3991_vm0, %v3990_v0  ;;  %3659 = vmatprep.subr.bf16.mxu1 %v3990_v0 }
  0x2a   : > { %3955 = vmatprep.subr.msk.bf16.mxu0 %vm972_vm2, %v939_v34 }
  0x2e   : > { %3632 = vmatmul.mubr.msk.bf16.vlgmr.msra.gmra.mrb[12].mxu0 %vm542_vm1, %v4160_v31 }
  0x2f   : > { %3638 = vmatmul.mubr.msk.bf16.vlgmr.msra.gmra.mrb[12].mxu1 %vm542_vm1, %v4163_v32  ;;  %3642 = vmatpush3.bf16.msra.mxu0 %v974_v35 }
  0x30   : > { %3661 = vmatprep.mubr.msk.bf16.mxu1 %vm3991_vm0, %v3990_v0  ;;  %3683 = vmatprep.subr.bf16.mxu0 %v3990_v0 }
  0xe9   : > { %v580_v36 = vpop.f32.mrb[0].mxu0 }
  0xea   : > { %v629_v37 = vpop.f32.mrb[0].mxu1  ;;  %v3597_v38 = vpop.f32.mrb[1].mxu0 }
  0xeb   : > { %v3603_v39 = vpop.f32.mrb[1].mxu1  ;;  %v583_v40 = vpop.f32.mrb[2].mxu0 }
  0xec   : > { %v930_v41 = vpack.c.bf16 %v583_v40, %v580_v36  ;;  %v632_v42 = vpop.f32.mrb[2].mxu1  ;;  %v3598_v43 = vpop.f32.mrb[3].mxu0 }
  0xed   : > { %v931_v44 = vpack.c.bf16 %v632_v42, %v629_v37  ;;  %v3604_v45 = vpop.f32.mrb[3].mxu1 }
  0xee   : > { %3643 = vmatprep.mubr.msk.bf16.mxu0 %vm947_vm3, %v930_v41 }
  0xef   : > { %3644 = vmatmul.mubr.msk.bf16.vlgmr.msra.gmra.mrb[16].mxu0 %vm947_vm3, %v931_v44 }
  0xf1   : > { %v678_v46 = vpop.f32.mrb[4].mxu0 }
  0xf2   : > { %v3609_v47 = vpop.f32.mrb[5].mxu0  ;;  %v727_v48 = vpop.f32.mrb[4].mxu1 }
  0xf3   : > { %v681_v49 = vpop.f32.mrb[6].mxu0  ;;  %v3615_v50 = vpop.f32.mrb[5].mxu1 }
  0xf4   : > { %v932_v51 = vpack.c.bf16 %v681_v49, %v678_v46  ;;  %v730_v52 = vpop.f32.mrb[6].mxu1  ;;  %v3610_v53 = vpop.f32.mrb[7].mxu0 }
  0xf5   : > { %v933_v54 = vpack.c.bf16 %v730_v52, %v727_v48  ;;  %v3616_v55 = vpop.f32.mrb[7].mxu1 }
  0xf6   : > { %3647 = vmatprep.mubr.msk.bf16.mxu0 %vm947_vm3, %v932_v51 }
  0xf7   : > { %3648 = vmatmul.mubr.msk.bf16.gmra.mrb[20].mxu0 %vm947_vm3, %v933_v54 }
  0xf9   : > { %v776_v56 = vpop.f32.mrb[8].mxu0 }
  0xfa   : > { %v3621_v57 = vpop.f32.mrb[9].mxu0  ;;  %v825_v58 = vpop.f32.mrb[8].mxu1 }
  0xfb   : > { %v779_v59 = vpop.f32.mrb[10].mxu0  ;;  %v3627_v60 = vpop.f32.mrb[9].mxu1 }
  0xfc   : > { %v934_v61 = vpack.c.bf16 %v779_v59, %v776_v56  ;;  %v828_v62 = vpop.f32.mrb[10].mxu1  ;;  %v3622_v63 = vpop.f32.mrb[11].mxu0 }
  0xfd   : > { %v935_v1 = vpack.c.bf16 %v828_v62, %v825_v58  ;;  %v3628_v2 = vpop.f32.mrb[11].mxu1 }
  0xfe   : > { %3651 = vmatprep.mubr.msk.bf16.mxu0 %vm947_vm3, %v934_v61 }
  0xff   : > { %3652 = vmatmul.mubr.msk.bf16.gmra.mrb[24].mxu0 %vm947_vm3, %v935_v1 }
 0x101   : > { %v874_v3 = vpop.f32.mrb[12].mxu0 }
 0x102   : > { %v3633_v4 = vpop.f32.mrb[13].mxu0  ;;  %v923_v5 = vpop.f32.mrb[12].mxu1 }
 0x103   : > { %v877_v6 = vpop.f32.mrb[14].mxu0  ;;  %v3639_v9 = vpop.f32.mrb[13].mxu1 }
 0x104   : > { %v936_v10 = vpack.c.bf16 %v877_v6, %v874_v3  ;;  %v926_v11 = vpop.f32.mrb[14].mxu1  ;;  %v3634_v12 = vpop.f32.mrb[15].mxu0 }
 0x105   : > { %v937_v13 = vpack.c.bf16 %v926_v11, %v923_v5  ;;  %v3640_v14 = vpop.f32.mrb[15].mxu1 }
 0x106   : > { %3655 = vmatprep.mubr.msk.bf16.mxu0 %vm947_vm3, %v936_v10 }
 0x107   : > { %3656 = vmatmul.mubr.msk.bf16.gmra.mrb[28].mxu0 %vm947_vm3, %v937_v13 }
 0x108   : > { %3685 = vmatprep.mubr.msk.bf16.mxu0 %vm3991_vm0, %v3990_v0 }
 0x1c2   : > { %v3645_v16 = vpop.f32.mrb[16].mxu0 }
 0x1c3   : > { %v1019_v17 = vadd.f32 %v3645_v16, %v4188_v15  ;;  %v1010_v18 = vpop.f32.mrb[17].mxu0 }
 0x1c4   : > { %v1011_v21 = vadd.f32 %v4188_v15, %v1010_v18  ;;  %v3646_v22 = vpop.f32.mrb[18].mxu0  ;;  %v1434_v18 = vld [vmem:[%s4626_s4 + $0x8] sm:$0xff] }
 0x1c5   : > { %v1022_v23 = vadd.f32 %v3646_v22, %v4188_v15  ;;  %v1013_v24 = vpop.f32.mrb[19].mxu0  ;;  %v1075_v26 = vmax.f32 %v1019_v17, 0.0  ;;  %v1435_v22 = vld [vmem:[%s4626_s4 + $0x10] sm:$0xff] }
 0x1c6   : > { %v1014_v25 = vadd.f32 %v4188_v15, %v1013_v24  ;;  %v1073_v30 = vmax.f32 %v1011_v21, 0.0 }
 0x1c7   : > { %v1076_v29 = vmax.f32 %v1022_v23, 0.0  ;;  %v1436_v23 = vld [vmem:[%s4626_s4 + $0x18] sm:$0xff] }
 0x1c8   : > { %v1074_v33 = vmax.f32 %v1014_v25, 0.0  ;;  %v1438_v24 = vpack.c.bf16 %v1436_v23, %v1435_v22 }
 0x1c9   : > { %v1090_v34 = vpack.c.bf16 %v1076_v29, %v1075_v26 }
 0x1ca   : > { %v1089_v35 = vpack.c.bf16 %v1074_v33, %v1073_v30  ;;  %v3649_v36 = vpop.f32.mrb[20].mxu0 }
 0x1cb   : > { %v1035_v37 = vadd.f32 %v3649_v36, %v4188_v15  ;;  %v1026_v38 = vpop.f32.mrb[21].mxu0 }
 0x1cc   : > { %3660 = vmatpush3.bf16.msra.mxu1 %v1089_v35  ;;  %v1027_v39 = vadd.f32 %v4188_v15, %v1026_v38  ;;  %v3650_v40 = vpop.f32.mrb[22].mxu0 }
 0x1cd   : > { %3665 = vmatprep.subr.bf16.mxu1 %v3990_v0  ;;  %v1079_v41 = vmax.f32 %v1035_v37, 0.0  ;;  %v1038_v42 = vadd.f32 %v3650_v40, %v4188_v15  ;;  %v1029_v43 = vpop.f32.mrb[23].mxu0 }
 0x1ce   : > { %v1077_v44 = vmax.f32 %v1027_v39, 0.0  ;;  %v1030_v45 = vadd.f32 %v4188_v15, %v1029_v43 }
 0x1cf   : > { %3662 = vmatmul.mubr.msk.bf16.vlgmr.msra.gmra.mrb[16].mxu1 %vm542_vm1, %v4099_v7  ;;  %v1080_v46 = vmax.f32 %v1038_v42, 0.0 }
 0x1d0   : > { %3666 = vmatpush3.bf16.msra.mxu1 %v1090_v34  ;;  %v1078_v47 = vmax.f32 %v1030_v45, 0.0  ;;  %3667 = vmatprep.mubr.msk.bf16.mxu1 %vm3991_vm0, %v3990_v0 }
 0x1d1   : > { %v1092_v48 = vpack.c.bf16 %v1080_v46, %v1079_v41  ;;  %3671 = vmatprep.subr.bf16.mxu1 %v3990_v0 }
 0x1d2   : > { %v1091_v49 = vpack.c.bf16 %v1078_v47, %v1077_v44  ;;  %v3653_v50 = vpop.f32.mrb[24].mxu0 }
 0x1d3   : > { %v1051_v51 = vadd.f32 %v3653_v50, %v4188_v15  ;;  %v1042_v52 = vpop.f32.mrb[25].mxu0 }
 0x1d4   : > { %v1043_v53 = vadd.f32 %v4188_v15, %v1042_v52  ;;  %v3654_v54 = vpop.f32.mrb[26].mxu0 }
 0x1d5   : > { %v1083_v55 = vmax.f32 %v1051_v51, 0.0  ;;  %v1054_v56 = vadd.f32 %v3654_v54, %v4188_v15  ;;  %v1045_v57 = vpop.f32.mrb[27].mxu0 }
 0x1d6   : > { %v1081_v58 = vmax.f32 %v1043_v53, 0.0  ;;  %v1046_v59 = vadd.f32 %v4188_v15, %v1045_v57 }
 0x1d7   : > { %3668 = vmatmul.mubr.msk.bf16.vlgmr.msra.gmra.mrb[20].mxu1 %vm542_vm1, %v4102_v8  ;;  %v1084_v60 = vmax.f32 %v1054_v56, 0.0 }
 0x1d8   : > { %3672 = vmatpush3.bf16.msra.mxu1 %v1091_v49  ;;  %3673 = vmatprep.mubr.msk.bf16.mxu1 %vm3991_vm0, %v3990_v0  ;;  %v1082_v61 = vmax.f32 %v1046_v59, 0.0 }
 0x1d9   : > { %3677 = vmatprep.subr.bf16.mxu1 %v3990_v0  ;;  %v1094_v62 = vpack.c.bf16 %v1084_v60, %v1083_v55 }
 0x1da   : > { %v1093_v63 = vpack.c.bf16 %v1082_v61, %v1081_v58  ;;  %v3657_v1 = vpop.f32.mrb[28].mxu0 }
 0x1db   : > { %v1067_v2 = vadd.f32 %v3657_v1, %v4188_v15  ;;  %v1058_v3 = vpop.f32.mrb[29].mxu0 }
 0x1dc   : > { %3684 = vmatpush3.bf16.msra.mxu0 %v1093_v63  ;;  %v1059_v4 = vadd.f32 %v4188_v15, %v1058_v3  ;;  %v3658_v5 = vpop.f32.mrb[30].mxu0 }
 0x1dd   : > { %v1087_v6 = vmax.f32 %v1067_v2, 0.0  ;;  %v1070_v9 = vadd.f32 %v3658_v5, %v4188_v15  ;;  %v1061_v10 = vpop.f32.mrb[31].mxu0  ;;  %3695 = vmatprep.subr.bf16.mxu0 %v3990_v0 }
 0x1de   : > { %v1085_v11 = vmax.f32 %v1059_v4, 0.0  ;;  %v1062_v12 = vadd.f32 %v4188_v15, %v1061_v10  ;;  %v1433_v15 = vld [vmem:[%s4626_s4] sm:$0xff] }
 0x1df   : > { %3674 = vmatmul.mubr.msk.bf16.vlgmr.msra.gmra.mrb[24].mxu1 %vm542_vm1, %v4124_v19  ;;  %3686 = vmatmul.mubr.msk.bf16.vlgmr.msra.gmra.mrb[32].mxu0 %vm542_vm1, %v4144_v27  ;;  %v1088_v13 = vmax.f32 %v1070_v9, 0.0  ;;  %v1437_v21 = vpack.c.bf16 %v1434_v18, %v1433_v15 }
 0x1e0   : > { %3678 = vmatpush3.bf16.msra.mxu1 %v1092_v48  ;;  %3679 = vmatprep.mubr.msk.bf16.mxu1 %vm3991_vm0, %v3990_v0  ;;  %v1086_v14 = vmax.f32 %v1062_v12, 0.0 }
 0x1e1   : > { %3689 = vmatprep.subr.bf16.mxu1 %v3990_v0  ;;  %v1096_v16 = vpack.c.bf16 %v1088_v13, %v1087_v6  ;;  %3697 = vmatprep.mubr.msk.bf16.mxu0 %vm3991_vm0, %v3990_v0  ;;  %v4269_v6 = vld [vmem:[%s4627_s5] ss:$0 sm:$0xff] }
 0x1e2   : > { %v1095_v17 = vpack.c.bf16 %v1086_v14, %v1085_v11 }
 0x1e4   : > { %3696 = vmatpush3.bf16.msra.mxu0 %v1095_v17 }
 0x1e5   : > { %3707 = vmatprep.subr.bf16.mxu0 %v1437_v21 }
 0x1e7   : > { %3680 = vmatmul.mubr.msk.bf16.vlgmr.msra.gmra.mrb[28].mxu1 %vm542_vm1, %v4128_v20  ;;  %3698 = vmatmul.mubr.msk.bf16.vlgmr.msra.gmra.mrb[36].mxu0 %vm542_vm1, %v4160_v31 }
 0x1e8   : > { %3690 = vmatpush3.bf16.msra.mxu1 %v1094_v62  ;;  %3691 = vmatprep.mubr.msk.bf16.mxu1 %vm3991_vm0, %v3990_v0 }
 0x1e9   : > { %3701 = vmatprep.subr.bf16.mxu1 %v3990_v0  ;;  %3708 = vmatpush3.bf16.msra.mxu0 %v1437_v21 }
 0x1ea   : > { %3709 = vmatprep.subr.bf16.mxu0 %v1438_v24 }
 0x1ed   : > { %3710 = vmatpush3.bf16.msra.mxu0 %v1438_v24 }
 0x1ee   : > { %3751 = vmatprep.subr.bf16.mxu0 %v3990_v0 }
 0x1ef   : > { %3692 = vmatmul.mubr.msk.bf16.vlgmr.msra.gmra.mrb[32].mxu1 %vm542_vm1, %v4148_v28 }
 0x1f0   : > { %3702 = vmatpush3.bf16.msra.mxu1 %v1096_v16  ;;  %3703 = vmatprep.mubr.msk.bf16.mxu1 %vm3991_vm0, %v3990_v0 }
 0x1f1   : > { %3727 = vmatprep.subr.bf16.mxu1 %v3990_v0 }
 0x1f7   : > { %3704 = vmatmul.mubr.msk.bf16.vlgmr.msra.gmra.mrb[36].mxu1 %vm542_vm1, %v4163_v32 }
 0x1f8   : > { %3729 = vmatprep.mubr.msk.bf16.mxu1 %vm3991_vm0, %v3990_v0 }
 0x2a2   : > { %v1131_v25 = vpop.f32.mrb[16].mxu1 }
 0x2a3   : > { %v3663_v26 = vpop.f32.mrb[17].mxu1 }
 0x2a4   : > { %v1134_v29 = vpop.f32.mrb[18].mxu1 }
 0x2a5   : > { %v1425_v30 = vpack.c.bf16 %v1134_v29, %v1131_v25  ;;  %v3664_v33 = vpop.f32.mrb[19].mxu1 }
 0x2a7   : > { %3711 = vmatprep.mubr.msk.bf16.mxu0 %vm1446_vm4, %v1425_v30 }
 0x2aa   : > { %v1172_v34 = vpop.f32.mrb[20].mxu1 }
 0x2ab   : > { %v3669_v35 = vpop.f32.mrb[21].mxu1 }
 0x2ac   : > { %v1175_v36 = vpop.f32.mrb[22].mxu1 }
 0x2ad   : > { %v1426_v37 = vpack.c.bf16 %v1175_v36, %v1172_v34  ;;  %v3670_v38 = vpop.f32.mrb[23].mxu1 }
 0x2af   : > { %3712 = vmatmul.mubr.msk.bf16.vlgmr.msra.gmra.mrb[40].mxu0 %vm1446_vm4, %v1426_v37 }
 0x2b2   : > { %v1213_v39 = vpop.f32.mrb[24].mxu1  ;;  %v1295_v40 = vpop.f32.mrb[32].mxu0 }
 0x2b3   : > { %v3675_v41 = vpop.f32.mrb[25].mxu1  ;;  %v3687_v42 = vpop.f32.mrb[33].mxu0 }
 0x2b4   : > { %v1216_v43 = vpop.f32.mrb[26].mxu1  ;;  %v1298_v44 = vpop.f32.mrb[34].mxu0 }
 0x2b5   : > { %v1427_v45 = vpack.c.bf16 %v1216_v43, %v1213_v39  ;;  %v3676_v46 = vpop.f32.mrb[27].mxu1  ;;  %v1429_v47 = vpack.c.bf16 %v1298_v44, %v1295_v40  ;;  %v3688_v48 = vpop.f32.mrb[35].mxu0 }
 0x2b7   : > { %3715 = vmatprep.mubr.msk.bf16.mxu0 %vm1446_vm4, %v1427_v45 }
 0x2ba   : > { %v1254_v49 = vpop.f32.mrb[28].mxu1  ;;  %v1377_v50 = vpop.f32.mrb[36].mxu0 }
 0x2bb   : > { %v3681_v51 = vpop.f32.mrb[29].mxu1  ;;  %v3699_v52 = vpop.f32.mrb[37].mxu0 }
 0x2bc   : > { %v1257_v53 = vpop.f32.mrb[30].mxu1  ;;  %v1380_v54 = vpop.f32.mrb[38].mxu0 }
 0x2bd   : > { %v1428_v55 = vpack.c.bf16 %v1257_v53, %v1254_v49  ;;  %v3682_v56 = vpop.f32.mrb[31].mxu1  ;;  %v1431_v57 = vpack.c.bf16 %v1380_v54, %v1377_v50  ;;  %v3700_v58 = vpop.f32.mrb[39].mxu0 }
 0x2bf   : > { %3716 = vmatmul.mubr.msk.bf16.gmra.mrb[44].mxu0 %vm1446_vm4, %v1428_v55 }
 0x2c0   : > { %3719 = vmatprep.mubr.msk.bf16.mxu0 %vm1446_vm4, %v1429_v47 }
 0x2c2   : > { %v1336_v59 = vpop.f32.mrb[32].mxu1 }
 0x2c3   : > { %v3693_v60 = vpop.f32.mrb[33].mxu1 }
 0x2c4   : > { %v1339_v61 = vpop.f32.mrb[34].mxu1 }
 0x2c5   : > { %v1430_v62 = vpack.c.bf16 %v1339_v61, %v1336_v59  ;;  %v3694_v63 = vpop.f32.mrb[35].mxu1 }
 0x2c7   : > { %3720 = vmatmul.mubr.msk.bf16.gmra.mrb[48].mxu0 %vm1446_vm4, %v1430_v62 }
 0x2c8   : > { %3723 = vmatprep.mubr.msk.bf16.mxu0 %vm1446_vm4, %v1431_v57 }
 0x2ca   : > { %v1418_v1 = vpop.f32.mrb[36].mxu1 }
 0x2cb   : > { %v3705_v2 = vpop.f32.mrb[37].mxu1 }
 0x2cc   : > { %v1421_v3 = vpop.f32.mrb[38].mxu1  ;;  %v1929_v2 = vld [vmem:[%s4628_s6 + $0x8] sm:$0xff] }
 0x2cd   : > { %v1432_v4 = vpack.c.bf16 %v1421_v3, %v1418_v1  ;;  %v3706_v5 = vpop.f32.mrb[39].mxu1  ;;  %v1928_v1 = vld [vmem:[%s4628_s6] sm:$0xff] }
 0x2cf   : > { %3724 = vmatmul.mubr.msk.bf16.gmra.mrb[52].mxu0 %vm1446_vm4, %v1432_v4 }
 0x2d0   : > { %3753 = vmatprep.mubr.msk.bf16.mxu0 %vm3991_vm0, %v3990_v0 }
 0x382   : > { %v3713_v9 = vpop.f32.mrb[40].mxu0 }
 0x383   : > { %v1514_v10 = vadd.f32 %v3713_v9, %v4269_v6  ;;  %v1505_v11 = vpop.f32.mrb[41].mxu0 }
 0x384   : > { %v1506_v12 = vadd.f32 %v4269_v6, %v1505_v11  ;;  %v3714_v13 = vpop.f32.mrb[42].mxu0  ;;  %v1934_v11 = vld [vmem:[%s4628_s6 + $0x30] sm:$0xff] }
 0x385   : > { %v1517_v14 = vadd.f32 %v3714_v13, %v4269_v6  ;;  %v1508_v16 = vpop.f32.mrb[43].mxu0  ;;  %v1570_v15 = vmax.f32 %v1514_v10, 0.0  ;;  %v1933_v10 = vld [vmem:[%s4628_s6 + $0x28] sm:$0xff] }
 0x386   : > { %v1509_v17 = vadd.f32 %v4269_v6, %v1508_v16  ;;  %v1568_v21 = vmax.f32 %v1506_v12, 0.0  ;;  %v1935_v12 = vld [vmem:[%s4628_s6 + $0x38] sm:$0xff]  ;;  %v2094_v16 = vld [vmem:[%s4630_s8 + $0x8] sm:$0xff] }
 0x387   : > { %v1571_v18 = vmax.f32 %v1517_v14, 0.0  ;;  %v1939_v13 = vpack.c.bf16 %v1935_v12, %v1934_v11  ;;  %v2093_v14 = vld [vmem:[%s4630_s8] sm:$0xff] }
 0x388   : > { %v1569_v22 = vmax.f32 %v1509_v17, 0.0  ;;  %v2095_v17 = vld [vmem:[%s4630_s8 + $0x10] sm:$0xff] }
 0x389   : > { %v1585_v23 = vpack.c.bf16 %v1571_v18, %v1570_v15  ;;  %v2105_v15 = vpack.c.bf16 %v2094_v16, %v2093_v14  ;;  %v2096_v18 = vld [vmem:[%s4630_s8 + $0x18] sm:$0xff] }
 0x38a   : > { %v1584_v24 = vpack.c.bf16 %v1569_v22, %v1568_v21  ;;  %v2106_v21 = vpack.c.bf16 %v2096_v18, %v2095_v17  ;;  %v2097_v22 = vld [vmem:[%s4630_s8 + $0x20] sm:$0xff] }
 0x38c   : > { %3728 = vmatpush3.bf16.msra.mxu1 %v1584_v24 }
 0x38d   : > { %3733 = vmatprep.subr.bf16.mxu1 %v3990_v0 }
 0x38f   : > { %3730 = vmatmul.mubr.msk.bf16.vlgmr.msra.gmra.mrb[40].mxu1 %vm542_vm1, %v4099_v7 }
 0x390   : > { %3734 = vmatpush3.bf16.msra.mxu1 %v1585_v23  ;;  %3735 = vmatprep.mubr.msk.bf16.mxu1 %vm3991_vm0, %v3990_v0  ;;  %v2098_v23 = vld [vmem:[%s4630_s8 + $0x28] sm:$0xff] }
 0x391   : > { %3739 = vmatprep.subr.bf16.mxu1 %v3990_v0  ;;  %v2107_v24 = vpack.c.bf16 %v2098_v23, %v2097_v22 }
 0x392   : > { %v3717_v25 = vpop.f32.mrb[44].mxu0 }
 0x393   : > { %v1530_v26 = vadd.f32 %v3717_v25, %v4269_v6  ;;  %v1521_v29 = vpop.f32.mrb[45].mxu0  ;;  %v2099_v25 = vld [vmem:[%s4630_s8 + $0x30] sm:$0xff] }
 0x394   : > { %v1522_v30 = vadd.f32 %v4269_v6, %v1521_v29  ;;  %v3718_v33 = vpop.f32.mrb[46].mxu0 }
 0x395   : > { %v1574_v34 = vmax.f32 %v1530_v26, 0.0  ;;  %v1533_v35 = vadd.f32 %v3718_v33, %v4269_v6  ;;  %v1524_v36 = vpop.f32.mrb[47].mxu0  ;;  %v2100_v26 = vld [vmem:[%s4630_s8 + $0x38] sm:$0xff] }
 0x396   : > { %v1572_v37 = vmax.f32 %v1522_v30, 0.0  ;;  %v1525_v7 = vadd.f32 %v4269_v6, %v1524_v36  ;;  %v2108_v29 = vpack.c.bf16 %v2100_v26, %v2099_v25 }
 0x397   : > { %v1575_v38 = vmax.f32 %v1533_v35, 0.0  ;;  %3736 = vmatmul.mubr.msk.bf16.vlgmr.msra.gmra.mrb[44].mxu1 %vm542_vm1, %v4102_v8 }
 0x398   : > { %v1573_v39 = vmax.f32 %v1525_v7, 0.0  ;;  %3741 = vmatprep.mubr.msk.bf16.mxu1 %vm3991_vm0, %v3990_v0 }
 0x399   : > { %v1587_v40 = vpack.c.bf16 %v1575_v38, %v1574_v34 }
 0x39a   : > { %v1586_v41 = vpack.c.bf16 %v1573_v39, %v1572_v37  ;;  %v3721_v42 = vpop.f32.mrb[48].mxu0 }
 0x39b   : > { %v1546_v43 = vadd.f32 %v3721_v42, %v4269_v6  ;;  %v1537_v44 = vpop.f32.mrb[49].mxu0 }
 0x39c   : > { %3740 = vmatpush3.bf16.msra.mxu1 %v1586_v41  ;;  %v1538_v45 = vadd.f32 %v4269_v6, %v1537_v44  ;;  %v3722_v46 = vpop.f32.mrb[50].mxu0 }
 0x39d   : > { %3745 = vmatprep.subr.bf16.mxu1 %v3990_v0  ;;  %v1578_v47 = vmax.f32 %v1546_v43, 0.0  ;;  %v1549_v48 = vadd.f32 %v3722_v46, %v4269_v6  ;;  %v1540_v8 = vpop.f32.mrb[51].mxu0 }
 0x39e   : > { %v1576_v49 = vmax.f32 %v1538_v45, 0.0  ;;  %v1541_v50 = vadd.f32 %v4269_v6, %v1540_v8 }
 0x39f   : > { %3742 = vmatmul.mubr.msk.bf16.vlgmr.msra.gmra.mrb[48].mxu1 %vm542_vm1, %v4124_v19  ;;  %v1579_v51 = vmax.f32 %v1549_v48, 0.0 }
 0x3a0   : > { %3746 = vmatpush3.bf16.msra.mxu1 %v1587_v40  ;;  %3747 = vmatprep.mubr.msk.bf16.mxu1 %vm3991_vm0, %v3990_v0  ;;  %v1577_v52 = vmax.f32 %v1541_v50, 0.0 }
 0x3a1   : > { %v1589_v53 = vpack.c.bf16 %v1579_v51, %v1578_v47  ;;  %3757 = vmatprep.subr.bf16.mxu1 %v3990_v0 }
 0x3a2   : > { %v1588_v54 = vpack.c.bf16 %v1577_v52, %v1576_v49  ;;  %v3725_v55 = vpop.f32.mrb[52].mxu0 }
 0x3a3   : > { %v1562_v56 = vadd.f32 %v3725_v55, %v4269_v6  ;;  %v1553_v57 = vpop.f32.mrb[53].mxu0 }
 0x3a4   : > { %3752 = vmatpush3.bf16.msra.mxu0 %v1588_v54  ;;  %v1554_v58 = vadd.f32 %v4269_v6, %v1553_v57  ;;  %v3726_v59 = vpop.f32.mrb[54].mxu0 }
 0x3a5   : > { %v1582_v60 = vmax.f32 %v1562_v56, 0.0  ;;  %v1565_v19 = vadd.f32 %v3726_v59, %v4269_v6  ;;  %v1556_v61 = vpop.f32.mrb[55].mxu0  ;;  %3763 = vmatprep.subr.bf16.mxu0 %v3990_v0 }
 0x3a6   : > { %v1580_v62 = vmax.f32 %v1554_v58, 0.0  ;;  %v1557_v63 = vadd.f32 %v4269_v6, %v1556_v61  ;;  %v1936_v6 = vpack.c.bf16 %v1929_v2, %v1928_v1 }
 0x3a7   : > { %3748 = vmatmul.mubr.msk.bf16.vlgmr.msra.gmra.mrb[52].mxu1 %vm542_vm1, %v4128_v20  ;;  %3754 = vmatmul.mubr.msk.bf16.vlgmr.msra.gmra.mrb[56].mxu0 %vm542_vm1, %v4144_v27  ;;  %v1583_v3 = vmax.f32 %v1565_v19, 0.0  ;;  %v1930_v20 = vld [vmem:[%s4628_s6 + $0x10] sm:$0xff]  ;;  %v1931_v27 = vld [vmem:[%s4628_s6 + $0x18] sm:$0xff] }
 0x3a8   : > { %3758 = vmatpush3.bf16.msra.mxu1 %v1589_v53  ;;  %3759 = vmatprep.mubr.msk.bf16.mxu1 %vm3991_vm0, %v3990_v0  ;;  %v1581_v4 = vmax.f32 %v1557_v63, 0.0 }
 0x3a9   : > { %v1591_v5 = vpack.c.bf16 %v1583_v3, %v1582_v60  ;;  %3769 = vmatprep.subr.bf16.mxu1 %v3990_v0  ;;  %3765 = vmatprep.mubr.msk.bf16.mxu0 %vm3991_vm0, %v3990_v0 }
 0x3aa   : > { %v1590_v9 = vpack.c.bf16 %v1581_v4, %v1580_v62 }
 0x3ac   : > { %3764 = vmatpush3.bf16.msra.mxu0 %v1590_v9  ;;  %v2102_v9 = vld [vmem:[%s4630_s8 + $0x48] sm:$0xff] }
 0x3ad   : > { %3775 = vmatprep.subr.bf16.mxu0 %v1936_v6 }
 0x3af   : > { %3760 = vmatmul.mubr.msk.bf16.vlgmr.msra.gmra.mrb[56].mxu1 %vm542_vm1, %v4148_v28  ;;  %3766 = vmatmul.mubr.msk.bf16.vlgmr.msra.gmra.mrb[60].mxu0 %vm542_vm1, %v4160_v31  ;;  %v1937_v28 = vpack.c.bf16 %v1931_v27, %v1930_v20  ;;  %v1932_v31 = vld [vmem:[%s4628_s6 + $0x20] sm:$0xff]  ;;  %v2103_v27 = vld [vmem:[%s4630_s8 + $0x50] sm:$0xff] }
 0x3b0   : > { %3770 = vmatpush3.bf16.msra.mxu1 %v1591_v5  ;;  %3771 = vmatprep.mubr.msk.bf16.mxu1 %vm3991_vm0, %v3990_v0 }
 0x3b1   : > { %3776 = vmatpush3.bf16.msra.mxu0 %v1936_v6  ;;  %3799 = vmatprep.subr.bf16.mxu1 %v2105_v15  ;;  %v2101_v6 = vld [vmem:[%s4630_s8 + $0x40] sm:$0xff] }
 0x3b2   : > { %3777 = vmatprep.subr.bf16.mxu0 %v1937_v28  ;;  %v2109_v20 = vpack.c.bf16 %v2102_v9, %v2101_v6 }
 0x3b5   : > { %3778 = vmatpush3.bf16.msra.mxu0 %v1937_v28  ;;  %v2104_v28 = vld [vmem:[%s4630_s8 + $0x58] sm:$0xff] }
 0x3b7   : > { %3772 = vmatmul.mubr.msk.bf16.vlgmr.msra.gmra.mrb[60].mxu1 %vm542_vm1, %v4163_v32  ;;  %v1938_v32 = vpack.c.bf16 %v1933_v10, %v1932_v31  ;;  %v2110_v31 = vpack.c.bf16 %v2104_v28, %v2103_v27  ;;  %v3404_v10 = vld [vmem:[%s4629_s7] ss:$0 sm:$0xff] }
 0x3b8   : > { %3800 = vmatpush3.bf16.msra.mxu1 %v2105_v15 }
 0x3b9   : > { %3779 = vmatprep.subr.bf16.mxu0 %v1938_v32  ;;  %3801 = vmatprep.subr.bf16.mxu1 %v2106_v21 }
 0x3ba   : > { %3780 = vmatpush3.bf16.msra.mxu0 %v1938_v32 }
 0x3bb   : > { %3781 = vmatprep.subr.bf16.mxu0 %v1939_v13 }
 0x3bc   : > { %3802 = vmatpush3.bf16.msra.mxu1 %v2106_v21 }
 0x3bd   : > { %3803 = vmatprep.subr.bf16.mxu1 %v2107_v24 }
 0x3be   : > { %3782 = vmatpush3.bf16.msra.mxu0 %v1939_v13 }
 0x3bf   : > { %3827 = vmatprep.subr.bf16.mxu0 %v3990_v0 }
 0x3c0   : > { %3804 = vmatpush3.bf16.msra.mxu1 %v2107_v24 }
 0x3c1   : > { %3805 = vmatprep.subr.bf16.mxu1 %v2108_v29 }
 0x3c4   : > { %3806 = vmatpush3.bf16.msra.mxu1 %v2108_v29 }
 0x3c5   : > { %3807 = vmatprep.subr.bf16.mxu1 %v2109_v20 }
 0x3c8   : > { %3808 = vmatpush3.bf16.msra.mxu1 %v2109_v20 }
 0x3c9   : > { %3809 = vmatprep.subr.bf16.mxu1 %v2110_v31 }
 0x3cc   : > { %3810 = vmatpush3.bf16.msra.mxu1 %v2110_v31 }
 0x3cd   : > { %3839 = vmatprep.subr.bf16.mxu1 %v3990_v0 }
 0x462   : > { %v1626_v30 = vpop.f32.mrb[40].mxu1 }
 0x463   : > { %v3731_v33 = vpop.f32.mrb[41].mxu1 }
 0x464   : > { %v1629_v34 = vpop.f32.mrb[42].mxu1 }
 0x465   : > { %v1920_v35 = vpack.c.bf16 %v1629_v34, %v1626_v30  ;;  %v3732_v36 = vpop.f32.mrb[43].mxu1 }
 0x467   : > { %3783 = vmatprep.mubr.msk.bf16.mxu0 %vm1947_vm5, %v1920_v35 }
 0x46a   : > { %v1667_v37 = vpop.f32.mrb[44].mxu1 }
 0x46b   : > { %v3737_v7 = vpop.f32.mrb[45].mxu1 }
 0x46c   : > { %v1670_v38 = vpop.f32.mrb[46].mxu1 }
 0x46d   : > { %v1921_v39 = vpack.c.bf16 %v1670_v38, %v1667_v37  ;;  %v3738_v40 = vpop.f32.mrb[47].mxu1 }
 0x46f   : > { %3784 = vmatmul.mubr.msk.bf16.vlgmr.msra.gmra.mrb[64].mxu0 %vm1947_vm5, %v1921_v39 }
 0x472   : > { %v1708_v41 = vpop.f32.mrb[48].mxu1 }
 0x473   : > { %v3743_v42 = vpop.f32.mrb[49].mxu1 }
 0x474   : > { %v1711_v43 = vpop.f32.mrb[50].mxu1 }
 0x475   : > { %v1922_v44 = vpack.c.bf16 %v1711_v43, %v1708_v41  ;;  %v3744_v45 = vpop.f32.mrb[51].mxu1 }
 0x477   : > { %3787 = vmatprep.mubr.msk.bf16.mxu0 %vm1947_vm5, %v1922_v44 }
 0x47a   : > { %v1749_v46 = vpop.f32.mrb[52].mxu1  ;;  %v1790_v47 = vpop.f32.mrb[56].mxu0 }
 0x47b   : > { %v3749_v48 = vpop.f32.mrb[53].mxu1  ;;  %v3755_v8 = vpop.f32.mrb[57].mxu0 }
 0x47c   : > { %v1752_v49 = vpop.f32.mrb[54].mxu1  ;;  %v1793_v50 = vpop.f32.mrb[58].mxu0 }
 0x47d   : > { %v1923_v51 = vpack.c.bf16 %v1752_v49, %v1749_v46  ;;  %v3750_v52 = vpop.f32.mrb[55].mxu1  ;;  %v1924_v53 = vpack.c.bf16 %v1793_v50, %v1790_v47  ;;  %v3756_v54 = vpop.f32.mrb[59].mxu0 }
 0x47f   : > { %3788 = vmatmul.mubr.msk.bf16.gmra.mrb[68].mxu0 %vm1947_vm5, %v1923_v51 }
 0x480   : > { %3791 = vmatprep.mubr.msk.bf16.mxu0 %vm1947_vm5, %v1924_v53 }
 0x482   : > { %v1831_v55 = vpop.f32.mrb[56].mxu1  ;;  %v1872_v56 = vpop.f32.mrb[60].mxu0 }
 0x483   : > { %v3761_v57 = vpop.f32.mrb[57].mxu1  ;;  %v3767_v58 = vpop.f32.mrb[61].mxu0 }
 0x484   : > { %v1834_v59 = vpop.f32.mrb[58].mxu1  ;;  %v1875_v60 = vpop.f32.mrb[62].mxu0 }
 0x485   : > { %v1925_v19 = vpack.c.bf16 %v1834_v59, %v1831_v55  ;;  %v3762_v61 = vpop.f32.mrb[59].mxu1  ;;  %v1926_v62 = vpack.c.bf16 %v1875_v60, %v1872_v56  ;;  %v3768_v63 = vpop.f32.mrb[63].mxu0 }
 0x487   : > { %3792 = vmatmul.mubr.msk.bf16.gmra.mrb[72].mxu0 %vm1947_vm5, %v1925_v19 }
 0x488   : > { %3795 = vmatprep.mubr.msk.bf16.mxu0 %vm1947_vm5, %v1926_v62 }
 0x48a   : > { %v1913_v1 = vpop.f32.mrb[60].mxu1 }
 0x48b   : > { %v3773_v2 = vpop.f32.mrb[61].mxu1 }
 0x48c   : > { %v1916_v3 = vpop.f32.mrb[62].mxu1 }
 0x48d   : > { %v1927_v4 = vpack.c.bf16 %v1916_v3, %v1913_v1  ;;  %v3774_v5 = vpop.f32.mrb[63].mxu1 }
 0x48f   : > { %3796 = vmatmul.mubr.msk.bf16.gmra.mrb[76].mxu0 %vm1947_vm5, %v1927_v4 }
 0x490   : > { %3829 = vmatprep.mubr.msk.bf16.mxu0 %vm3991_vm0, %v3990_v0 }
 0x542   : > { %v3785_v32 = vpop.f32.mrb[64].mxu0 }
 0x543   : > { %v2015_v11 = vadd.f32 %v3785_v32, %v3404_v10  ;;  %v2006_v12 = vpop.f32.mrb[65].mxu0 }
 0x544   : > { %v2007_v13 = vadd.f32 %v3404_v10, %v2006_v12  ;;  %v3786_v14 = vpop.f32.mrb[66].mxu0  ;;  %v4416_v12 = vld [vmem:[%s4087_s20 + $0x8] sm:$0xff]  }
 0x545   : > { %v2018_v16 = vadd.f32 %v3786_v14, %v3404_v10  ;;  %v2009_v17 = vpop.f32.mrb[67].mxu0  ;;  %v2071_v18 = vmax.f32 %v2015_v11, 0.0 }
 0x546   : > { %v2010_v15 = vadd.f32 %v3404_v10, %v2009_v17  ;;  %v2069_v22 = vmax.f32 %v2007_v13, 0.0 }
 0x547   : > { %v2072_v21 = vmax.f32 %v2018_v16, 0.0 }
 0x548   : > { %v2070_v23 = vmax.f32 %v2010_v15, 0.0 }
 0x549   : > { %v2086_v24 = vpack.c.bf16 %v2072_v21, %v2071_v18  ;;  %v4425_v18 = vld [vmem:[%s4087_s20 + $0x10] sm:$0xff]  }
 0x54a   : > { %v2085_v25 = vpack.c.bf16 %v2070_v23, %v2069_v22  ;;  %v4430_v22 = vld [vmem:[%s4087_s20 + $0x18] sm:$0xff]  }
 0x54c   : > { %3811 = vmatprep.mubr.msk.bf16.mxu1 %vm2111_vm6, %v2085_v25 }
 0x54d   : > { %3812 = vmatmul.mubr.msk.bf16.vlgmr.msra.gmra.mrb[64].mxu1 %vm2111_vm6, %v2086_v24 }
 0x552   : > { %v3789_v26 = vpop.f32.mrb[68].mxu0 }
 0x553   : > { %v2031_v29 = vadd.f32 %v3789_v26, %v3404_v10  ;;  %v2022_v30 = vpop.f32.mrb[69].mxu0 }
 0x554   : > { %v2023_v33 = vadd.f32 %v3404_v10, %v2022_v30  ;;  %v3790_v34 = vpop.f32.mrb[70].mxu0  ;;  %v2616_v30 = vld [vmem:[%s4632_s10] sm:$0xff] }
 0x555   : > { %v2075_v35 = vmax.f32 %v2031_v29, 0.0  ;;  %v2034_v36 = vadd.f32 %v3790_v34, %v3404_v10  ;;  %v2025_v37 = vpop.f32.mrb[71].mxu0  ;;  %v4447_v34 = vld [vmem:[%s4087_s20 + $0x20] sm:$0xff]  }
 0x556   : > { %v2073_v7 = vmax.f32 %v2023_v33, 0.0  ;;  %v2026_v38 = vadd.f32 %v3404_v10, %v2025_v37  ;;  %v2617_v33 = vld [vmem:[%s4632_s10 + $0x8] sm:$0xff] }
 0x557   : > { %v2076_v39 = vmax.f32 %v2034_v36, 0.0 }
 0x558   : > { %v2074_v40 = vmax.f32 %v2026_v38, 0.0 }
 0x559   : > { %v2088_v41 = vpack.c.bf16 %v2076_v39, %v2075_v35  ;;  %v4452_v35 = vld [vmem:[%s4087_s20 + $0x28] sm:$0xff]   ;;  %v2624_v39 = vpack.c.bf16 %v2617_v33, %v2616_v30 }
 0x55a   : > { %v2087_v42 = vpack.c.bf16 %v2074_v40, %v2073_v7  ;;  %v3793_v43 = vpop.f32.mrb[72].mxu0 }
 0x55b   : > { %v2047_v44 = vadd.f32 %v3793_v43, %v3404_v10  ;;  %v2038_v45 = vpop.f32.mrb[73].mxu0  ;;  %v2618_v43 = vld [vmem:[%s4632_s10 + $0x10] sm:$0xff] }
 0x55c   : > { %3815 = vmatprep.mubr.msk.bf16.mxu1 %vm2111_vm6, %v2087_v42  ;;  %v2039_v46 = vadd.f32 %v3404_v10, %v2038_v45  ;;  %v3794_v47 = vpop.f32.mrb[74].mxu0  ;;  %v4467_v42 = vld [vmem:[%s4087_s20 + $0x38] sm:$0xff]  }
 0x55d   : > { %3816 = vmatmul.mubr.msk.bf16.gmra.mrb[68].mxu1 %vm2111_vm6, %v2088_v41  ;;  %v2079_v48 = vmax.f32 %v2047_v44, 0.0  ;;  %v2050_v8 = vadd.f32 %v3794_v47, %v3404_v10  ;;  %v2041_v49 = vpop.f32.mrb[75].mxu0  ;;  %v4462_v41 = vld [vmem:[%s4087_s20 + $0x30] sm:$0xff]   ;;  %v2619_v44 = vld [vmem:[%s4632_s10 + $0x18] sm:$0xff]  ;;  %v2621_v47 = vld [vmem:[%s4632_s10 + $0x28] sm:$0xff] }
 0x55e   : > { %v2077_v50 = vmax.f32 %v2039_v46, 0.0  ;;  %v2042_v51 = vadd.f32 %v3404_v10, %v2041_v49  ;;  %v2625_v45 = vpack.c.bf16 %v2619_v44, %v2618_v43  ;;  %v2620_v46 = vld [vmem:[%s4632_s10 + $0x20] sm:$0xff]  ;;  %v2623_v49 = vld [vmem:[%s4632_s10 + $0x38] sm:$0xff] }
 0x55f   : > { %v2080_v52 = vmax.f32 %v2050_v8, 0.0  ;;  %v2622_v8 = vld [vmem:[%s4632_s10 + $0x30] sm:$0xff] }
 0x560   : > { %v2078_v53 = vmax.f32 %v2042_v51, 0.0  ;;  %v4495_v51 = vld [vmem:[%s4631_s9] ss:$0 sm:$0xff] }
 0x561   : > { %v2090_v54 = vpack.c.bf16 %v2080_v52, %v2079_v48  ;;  %v2626_v48 = vpack.c.bf16 %v2621_v47, %v2620_v46 }
 0x562   : > { %v2089_v55 = vpack.c.bf16 %v2078_v53, %v2077_v50  ;;  %v3797_v56 = vpop.f32.mrb[76].mxu0  ;;  %v2627_v50 = vpack.c.bf16 %v2623_v49, %v2622_v8 }
 0x563   : > { %v2063_v57 = vadd.f32 %v3797_v56, %v3404_v10  ;;  %v2054_v58 = vpop.f32.mrb[77].mxu0 }
 0x564   : > { %3819 = vmatprep.mubr.msk.bf16.mxu1 %vm2111_vm6, %v2089_v55  ;;  %v2055_v59 = vadd.f32 %v3404_v10, %v2054_v58  ;;  %v3798_v60 = vpop.f32.mrb[78].mxu0 }
 0x565   : > { %3820 = vmatmul.mubr.msk.bf16.gmra.mrb[72].mxu1 %vm2111_vm6, %v2090_v54  ;;  %v2083_v19 = vmax.f32 %v2063_v57, 0.0  ;;  %v2066_v61 = vadd.f32 %v3798_v60, %v3404_v10  ;;  %v2057_v62 = vpop.f32.mrb[79].mxu0 }
 0x566   : > { %v2081_v63 = vmax.f32 %v2055_v59, 0.0  ;;  %v2058_v1 = vadd.f32 %v3404_v10, %v2057_v62  ;;  %v4408_v10 = vld [vmem:[%s4087_s20] sm:$0xff]  }
 0x567   : > { %v2084_v2 = vmax.f32 %v2066_v61, 0.0 }
 0x568   : > { %v2082_v3 = vmax.f32 %v2058_v1, 0.0 }
 0x569   : > { %v2092_v4 = vpack.c.bf16 %v2084_v2, %v2083_v19 }
 0x56a   : > { %v2091_v5 = vpack.c.bf16 %v2082_v3, %v2081_v63 }
 0x56c   : > { %3823 = vmatprep.mubr.msk.bf16.mxu1 %vm2111_vm6, %v2091_v5 }
 0x56d   : > { %3824 = vmatmul.mubr.msk.bf16.gmra.mrb[76].mxu1 %vm2111_vm6, %v2092_v4 }
 0x56e   : > { %3841 = vmatprep.mubr.msk.bf16.mxu1 %vm3991_vm0, %v3990_v0 }
 0x620   : > { %v3813_v6 = vpop.f32.mrb[64].mxu1 }
 0x621   : > { %v2170_v9 = vpop.f32.mrb[65].mxu1 }
 0x622   : > { %v3814_v20 = vpop.f32.mrb[66].mxu1 }
 0x623   : > { %v2234_v27 = vpack.c.bf16 %v3814_v20, %v3813_v6  ;;  %v2173_v28 = vpop.f32.mrb[67].mxu1 }
 0x624   : > { %v2233_v31 = vpack.c.bf16 %v2173_v28, %v2170_v9 }
 0x626   : > { %3828 = vmatpush3.bf16.msra.mxu0 %v2233_v31 }
 0x627   : > { %3833 = vmatprep.subr.bf16.mxu0 %v3990_v0 }
 0x629   : > { %3830 = vmatmul.mubr.msk.bf16.vlgmr.msra.gmra.mrb[80].mxu0 %vm542_vm1, %v4408_v10 }
 0x62a   : > { %3834 = vmatpush3.bf16.msra.mxu0 %v2234_v27  ;;  %3835 = vmatprep.mubr.msk.bf16.mxu0 %vm3991_vm0, %v3990_v0 }
 0x62b   : > { %3845 = vmatprep.subr.bf16.mxu0 %v3990_v0 }
 0x630   : > { %v3817_v32 = vpop.f32.mrb[68].mxu1 }
 0x631   : > { %v2186_v11 = vpop.f32.mrb[69].mxu1  ;;  %3836 = vmatmul.mubr.msk.bf16.vlgmr.msra.gmra.mrb[84].mxu0 %vm542_vm1, %v4416_v12 }
 0x632   : > { %v3818_v13 = vpop.f32.mrb[70].mxu1  ;;  %3847 = vmatprep.mubr.msk.bf16.mxu0 %vm3991_vm0, %v3990_v0 }
 0x633   : > { %v2236_v14 = vpack.c.bf16 %v3818_v13, %v3817_v32  ;;  %v2189_v16 = vpop.f32.mrb[71].mxu1 }
 0x634   : > { %v2235_v17 = vpack.c.bf16 %v2189_v16, %v2186_v11 }
 0x635   : > { %3846 = vmatpush3.bf16.msra.mxu0 %v2236_v14 }
 0x636   : > { %3840 = vmatpush3.bf16.msra.mxu1 %v2235_v17  ;;  %3857 = vmatprep.subr.bf16.mxu0 %v3990_v0 }
 0x637   : > { %3851 = vmatprep.subr.bf16.mxu1 %v3990_v0 }
 0x638   : > { %v3821_v15 = vpop.f32.mrb[72].mxu1 }
 0x639   : > { %3842 = vmatmul.mubr.msk.bf16.vlgmr.msra.gmra.mrb[80].mxu1 %vm542_vm1, %v4425_v18  ;;  %v2202_v21 = vpop.f32.mrb[73].mxu1  ;;  %3848 = vmatmul.mubr.msk.bf16.vlgmr.msra.gmra.mrb[88].mxu0 %vm542_vm1, %v4430_v22 }
 0x63a   : > { %v3822_v23 = vpop.f32.mrb[74].mxu1  ;;  %3853 = vmatprep.mubr.msk.bf16.mxu1 %vm3991_vm0, %v3990_v0  ;;  %3859 = vmatprep.mubr.msk.bf16.mxu0 %vm3991_vm0, %v3990_v0 }
 0x63b   : > { %v2238_v24 = vpack.c.bf16 %v3822_v23, %v3821_v15  ;;  %v2205_v25 = vpop.f32.mrb[75].mxu1 }
 0x63c   : > { %v2237_v26 = vpack.c.bf16 %v2205_v25, %v2202_v21 }
 0x63d   : > { %3858 = vmatpush3.bf16.msra.mxu0 %v2238_v24 }
 0x63e   : > { %3852 = vmatpush3.bf16.msra.mxu1 %v2237_v26  ;;  %3869 = vmatprep.subr.bf16.mxu0 %v3990_v0 }
 0x63f   : > { %3863 = vmatprep.subr.bf16.mxu1 %v3990_v0 }
 0x640   : > { %v3825_v29 = vpop.f32.mrb[76].mxu1 }
 0x641   : > { %3854 = vmatmul.mubr.msk.bf16.vlgmr.msra.gmra.mrb[84].mxu1 %vm542_vm1, %v4447_v34  ;;  %3860 = vmatmul.mubr.msk.bf16.vlgmr.msra.gmra.mrb[92].mxu0 %vm542_vm1, %v4452_v35  ;;  %v2218_v36 = vpop.f32.mrb[77].mxu1 }
 0x642   : > { %v3826_v37 = vpop.f32.mrb[78].mxu1  ;;  %3865 = vmatprep.mubr.msk.bf16.mxu1 %vm3991_vm0, %v3990_v0  ;;  %3871 = vmatprep.mubr.msk.bf16.mxu0 %vm3991_vm0, %v3990_v0 }
 0x643   : > { %v2240_v7 = vpack.c.bf16 %v3826_v37, %v3825_v29  ;;  %v2221_v38 = vpop.f32.mrb[79].mxu1 }
 0x644   : > { %v2239_v40 = vpack.c.bf16 %v2221_v38, %v2218_v36 }
 0x645   : > { %3870 = vmatpush3.bf16.msra.mxu0 %v2240_v7 }
 0x646   : > { %3864 = vmatpush3.bf16.msra.mxu1 %v2239_v40  ;;  %3899 = vmatprep.subr.bf16.mxu0 %v3990_v0 }
 0x647   : > { %3875 = vmatprep.subr.bf16.mxu1 %v2624_v39 }
 0x649   : > { %3866 = vmatmul.mubr.msk.bf16.vlgmr.msra.gmra.mrb[88].mxu1 %vm542_vm1, %v4462_v41  ;;  %3872 = vmatmul.mubr.msk.bf16.vlgmr.msra.gmra.mrb[96].mxu0 %vm542_vm1, %v4467_v42 }
 0x64a   : > { %3876 = vmatpush3.bf16.msra.mxu1 %v2624_v39  ;;  %3901 = vmatprep.mubr.msk.bf16.mxu0 %vm3991_vm0, %v3990_v0 }
 0x64b   : > { %3877 = vmatprep.subr.bf16.mxu1 %v2625_v45 }
 0x64e   : > { %3878 = vmatpush3.bf16.msra.mxu1 %v2625_v45 }
 0x64f   : > { %3879 = vmatprep.subr.bf16.mxu1 %v2626_v48 }
 0x652   : > { %3880 = vmatpush3.bf16.msra.mxu1 %v2626_v48 }
 0x653   : > { %3881 = vmatprep.subr.bf16.mxu1 %v2627_v50 }
 0x656   : > { %3882 = vmatpush3.bf16.msra.mxu1 %v2627_v50 }
 0x657   : > { %3929 = vmatprep.subr.bf16.mxu1 %v3990_v0 }
 0x6fc   : > { %v2275_v52 = vpop.f32.mrb[80].mxu0 }
 0x6fd   : > { %v2576_v53 = vadd.f32 %v4495_v51, %v2275_v52  ;;  %v3831_v54 = vpop.f32.mrb[81].mxu0 }
 0x6fe   : > { %v2278_v55 = vpop.f32.mrb[82].mxu0 }
 0x6ff   : > { %v2577_v56 = vadd.f32 %v4495_v51, %v2278_v55  ;;  %v3832_v57 = vpop.f32.mrb[83].mxu0  ;;  %v2592_v58 = vmax.f32 %v2576_v53, 0.0 }
 0x701   : > { %v2593_v59 = vmax.f32 %v2577_v56, 0.0 }
 0x703   : > { %v2608_v60 = vpack.c.bf16 %v2593_v59, %v2592_v58 }
 0x704   : > { %v2316_v19 = vpop.f32.mrb[84].mxu0 }
 0x705   : > { %v2578_v61 = vadd.f32 %v4495_v51, %v2316_v19  ;;  %v3837_v62 = vpop.f32.mrb[85].mxu0  ;;  %3883 = vmatprep.mubr.msk.bf16.mxu1 %vm1947_vm5, %v2608_v60 }
 0x706   : > { %v2319_v63 = vpop.f32.mrb[86].mxu0 }
 0x707   : > { %v2579_v1 = vadd.f32 %v4495_v51, %v2319_v63  ;;  %v3838_v2 = vpop.f32.mrb[87].mxu0  ;;  %v2594_v3 = vmax.f32 %v2578_v61, 0.0 }
 0x709   : > { %v2595_v4 = vmax.f32 %v2579_v1, 0.0 }
 0x70b   : > { %v2609_v5 = vpack.c.bf16 %v2595_v4, %v2594_v3 }
 0x70c   : > { %v2357_v6 = vpop.f32.mrb[80].mxu1  ;;  %v2398_v9 = vpop.f32.mrb[88].mxu0 }
 0x70d   : > { %3884 = vmatmul.mubr.msk.bf16.vlgmr.msra.gmra.mrb[92].mxu1 %vm1947_vm5, %v2609_v5  ;;  %v2580_v20 = vadd.f32 %v4495_v51, %v2357_v6  ;;  %v3843_v27 = vpop.f32.mrb[81].mxu1  ;;  %v2582_v28 = vadd.f32 %v4495_v51, %v2398_v9  ;;  %v3849_v31 = vpop.f32.mrb[89].mxu0 }
 0x70e   : > { %v2360_v32 = vpop.f32.mrb[82].mxu1  ;;  %v2401_v11 = vpop.f32.mrb[90].mxu0 }
 0x70f   : > { %v2596_v13 = vmax.f32 %v2580_v20, 0.0  ;;  %v2598_v14 = vmax.f32 %v2582_v28, 0.0  ;;  %v2581_v16 = vadd.f32 %v4495_v51, %v2360_v32  ;;  %v2583_v17 = vadd.f32 %v4495_v51, %v2401_v11  ;;  %v3844_v15 = vpop.f32.mrb[83].mxu1  ;;  %v3850_v21 = vpop.f32.mrb[91].mxu0 }
 0x711   : > { %v2597_v23 = vmax.f32 %v2581_v16, 0.0  ;;  %v2599_v24 = vmax.f32 %v2583_v17, 0.0 }
 0x713   : > { %v2610_v25 = vpack.c.bf16 %v2597_v23, %v2596_v13  ;;  %v2611_v26 = vpack.c.bf16 %v2599_v24, %v2598_v14 }
 0x714   : > { %v2439_v29 = vpop.f32.mrb[84].mxu1  ;;  %v2480_v30 = vpop.f32.mrb[92].mxu0 }
 0x715   : > { %3887 = vmatprep.mubr.msk.bf16.mxu1 %vm1947_vm5, %v2610_v25  ;;  %v2584_v33 = vadd.f32 %v4495_v51, %v2439_v29  ;;  %v3855_v36 = vpop.f32.mrb[85].mxu1  ;;  %v2586_v37 = vadd.f32 %v4495_v51, %v2480_v30  ;;  %v3861_v7 = vpop.f32.mrb[93].mxu0 }
 0x716   : > { %3888 = vmatmul.mubr.msk.bf16.gmra.mrb[96].mxu1 %vm1947_vm5, %v2611_v26  ;;  %v2442_v38 = vpop.f32.mrb[86].mxu1  ;;  %v2483_v39 = vpop.f32.mrb[94].mxu0  ;;  %v4576_v36 = vld [vmem:[%s4633_s11] ss:$0 sm:$0xff] }
 0x717   : > { %v2600_v40 = vmax.f32 %v2584_v33, 0.0  ;;  %v2602_v43 = vmax.f32 %v2586_v37, 0.0  ;;  %v2585_v44 = vadd.f32 %v4495_v51, %v2442_v38  ;;  %v2587_v45 = vadd.f32 %v4495_v51, %v2483_v39  ;;  %v3856_v46 = vpop.f32.mrb[87].mxu1  ;;  %v3862_v47 = vpop.f32.mrb[95].mxu0 }
 0x719   : > { %v2601_v48 = vmax.f32 %v2585_v44, 0.0  ;;  %v2603_v8 = vmax.f32 %v2587_v45, 0.0 }
 0x71b   : > { %v2612_v49 = vpack.c.bf16 %v2601_v48, %v2600_v40  ;;  %v2613_v50 = vpack.c.bf16 %v2603_v8, %v2602_v43 }
 0x71c   : > { %v2521_v52 = vpop.f32.mrb[88].mxu1  ;;  %v2562_v53 = vpop.f32.mrb[96].mxu0 }
 0x71d   : > { %3891 = vmatprep.mubr.msk.bf16.mxu1 %vm1947_vm5, %v2612_v49  ;;  %v2588_v54 = vadd.f32 %v4495_v51, %v2521_v52  ;;  %v3867_v55 = vpop.f32.mrb[89].mxu1  ;;  %v2590_v56 = vadd.f32 %v4495_v51, %v2562_v53  ;;  %v3873_v57 = vpop.f32.mrb[97].mxu0 }
 0x71e   : > { %3892 = vmatmul.mubr.msk.bf16.gmra.mrb[100].mxu1 %vm1947_vm5, %v2613_v50  ;;  %v2524_v58 = vpop.f32.mrb[90].mxu1  ;;  %v2565_v59 = vpop.f32.mrb[98].mxu0 }
 0x71f   : > { %v2604_v60 = vmax.f32 %v2588_v54, 0.0  ;;  %v2606_v19 = vmax.f32 %v2590_v56, 0.0  ;;  %v2589_v61 = vadd.f32 %v4495_v51, %v2524_v58  ;;  %v2591_v62 = vadd.f32 %v4495_v51, %v2565_v59  ;;  %v3868_v63 = vpop.f32.mrb[91].mxu1  ;;  %v3874_v1 = vpop.f32.mrb[99].mxu0 }
 0x721   : > { %v2605_v2 = vmax.f32 %v2589_v61, 0.0  ;;  %v2607_v3 = vmax.f32 %v2591_v62, 0.0 }
 0x723   : > { %v2614_v4 = vpack.c.bf16 %v2605_v2, %v2604_v60  ;;  %v2615_v5 = vpack.c.bf16 %v2607_v3, %v2606_v19 }
 0x725   : > { %3895 = vmatprep.mubr.msk.bf16.mxu1 %vm1947_vm5, %v2614_v4 }
 0x726   : > { %3896 = vmatmul.mubr.msk.bf16.gmra.mrb[104].mxu1 %vm1947_vm5, %v2615_v5 }
 0x727   : > { %3931 = vmatprep.mubr.msk.bf16.mxu1 %vm3991_vm0, %v3990_v0 }
 0x7e0   : > { %v3885_v6 = vpop.f32.mrb[92].mxu1 }
 0x7e1   : > { %v2686_v9 = vpop.f32.mrb[93].mxu1 }
 0x7e2   : > { %v3886_v20 = vpop.f32.mrb[94].mxu1 }
 0x7e3   : > { %v2750_v27 = vpack.c.bf16 %v3886_v20, %v3885_v6  ;;  %v2689_v28 = vpop.f32.mrb[95].mxu1 }
 0x7e4   : > { %v2749_v31 = vpack.c.bf16 %v2689_v28, %v2686_v9 }
 0x7e6   : > { %3900 = vmatpush3.bf16.msra.mxu0 %v2749_v31 }
 0x7e7   : > { %3905 = vmatprep.subr.bf16.mxu0 %v3990_v0 }
 0x7e9   : > { %3902 = vmatmul.mubr.msk.bf16.vlgmr.msra.gmra.mrb[100].mxu0 %vm542_vm1, %v4408_v10  ;;  %v3889_v51 = vpop.f32.mrb[96].mxu1 }
 0x7ea   : > { %3906 = vmatpush3.bf16.msra.mxu0 %v2750_v27  ;;  %3907 = vmatprep.mubr.msk.bf16.mxu0 %vm3991_vm0, %v3990_v0  ;;  %v2702_v32 = vpop.f32.mrb[97].mxu1 }
 0x7eb   : > { %v3890_v11 = vpop.f32.mrb[98].mxu1  ;;  %3911 = vmatprep.subr.bf16.mxu0 %v3990_v0 }
 0x7ec   : > { %v2752_v13 = vpack.c.bf16 %v3890_v11, %v3889_v51  ;;  %v2705_v14 = vpop.f32.mrb[99].mxu1 }
 0x7ed   : > { %v2751_v16 = vpack.c.bf16 %v2705_v14, %v2702_v32 }
 0x7f1   : > { %3908 = vmatmul.mubr.msk.bf16.vlgmr.msra.gmra.mrb[104].mxu0 %vm542_vm1, %v4416_v12  ;;  %v3893_v17 = vpop.f32.mrb[100].mxu1 }
 0x7f2   : > { %3912 = vmatpush3.bf16.msra.mxu0 %v2751_v16  ;;  %3913 = vmatprep.mubr.msk.bf16.mxu0 %vm3991_vm0, %v3990_v0  ;;  %v2718_v10 = vpop.f32.mrb[101].mxu1 }
 0x7f3   : > { %3917 = vmatprep.subr.bf16.mxu0 %v3990_v0  ;;  %v3894_v15 = vpop.f32.mrb[102].mxu1 }
 0x7f4   : > { %v2754_v21 = vpack.c.bf16 %v3894_v15, %v3893_v17  ;;  %v2721_v23 = vpop.f32.mrb[103].mxu1 }
 0x7f5   : > { %v2753_v24 = vpack.c.bf16 %v2721_v23, %v2718_v10 }
 0x7f6   : > { %3930 = vmatpush3.bf16.msra.mxu1 %v2754_v21 }
 0x7f7   : > { %3941 = vmatprep.subr.bf16.mxu1 %v3990_v0 }
 0x7f9   : > { %3914 = vmatmul.mubr.msk.bf16.vlgmr.msra.gmra.mrb[108].mxu0 %vm542_vm1, %v4425_v18  ;;  %v3897_v25 = vpop.f32.mrb[104].mxu1  ;;  %3932 = vmatmul.mubr.msk.bf16.vlgmr.msra.gmra.mrb[108].mxu1 %vm542_vm1, %v4452_v35  ;;  %v3188_v18 = vld [vmem:[%s4634_s12] sm:$0xff]  ;;  %v3190_v35 = vld [vmem:[%s4634_s12 + $0x10] sm:$0xff] }
 0x7fa   : > { %3918 = vmatpush3.bf16.msra.mxu0 %v2752_v13  ;;  %3919 = vmatprep.mubr.msk.bf16.mxu0 %vm3991_vm0, %v3990_v0  ;;  %v2734_v12 = vpop.f32.mrb[105].mxu1 }
 0x7fb   : > { %3923 = vmatprep.subr.bf16.mxu0 %v3990_v0  ;;  %v3898_v26 = vpop.f32.mrb[106].mxu1  ;;  %3943 = vmatprep.mubr.msk.bf16.mxu1 %vm3991_vm0, %v3990_v0 }
 0x7fc   : > { %v2756_v29 = vpack.c.bf16 %v3898_v26, %v3897_v25  ;;  %v2737_v30 = vpop.f32.mrb[107].mxu1 }
 0x7fd   : > { %v2755_v33 = vpack.c.bf16 %v2737_v30, %v2734_v12 }
 0x7fe   : > { %3942 = vmatpush3.bf16.msra.mxu1 %v2756_v29 }
 0x801   : > { %3920 = vmatmul.mubr.msk.bf16.vlgmr.msra.gmra.mrb[112].mxu0 %vm542_vm1, %v4430_v22  ;;  %3944 = vmatmul.mubr.msk.bf16.vlgmr.msra.gmra.mrb[112].mxu1 %vm542_vm1, %v4467_v42  ;;  %v3189_v22 = vld [vmem:[%s4634_s12 + $0x8] sm:$0xff] }
 0x802   : > { %3924 = vmatpush3.bf16.msra.mxu0 %v2753_v24  ;;  %3925 = vmatprep.mubr.msk.bf16.mxu0 %vm3991_vm0, %v3990_v0 }
 0x803   : > { %3935 = vmatprep.subr.bf16.mxu0 %v3990_v0 }
 0x809   : > { %3926 = vmatmul.mubr.msk.bf16.vlgmr.msra.gmra.mrb[116].mxu0 %vm542_vm1, %v4447_v34  ;;  %v3192_v34 = vpack.c.bf16 %v3189_v22, %v3188_v18 }
 0x80a   : > { %3936 = vmatpush3.bf16.msra.mxu0 %v2755_v33  ;;  %3937 = vmatprep.mubr.msk.bf16.mxu0 %vm3991_vm0, %v3990_v0 }
 0x80b   : > { %3947 = vmatprep.subr.bf16.mxu0 %v3990_v0 }
 0x811   : > { %3938 = vmatmul.mubr.msk.bf16.vlgmr.msra.gmra.mrb[120].mxu0 %vm542_vm1, %v4462_v41  ;;  %v3191_v41 = vld [vmem:[%s4634_s12 + $0x18] sm:$0xff] }
 0x812   : > { %3951 = vmatprep.mubr.msk.bf16.mxu0 %vm3991_vm0, %v3990_v0  ;;  %3948 = vmatpush3.bf16.msra.mxu0 %v3192_v34  ;;  %v3193_v42 = vpack.c.bf16 %v3191_v41, %v3190_v35 }
 0x813   : > { %3949 = vmatprep.subr.bf16.mxu0 %v3990_v0 }
 0x816   : > { %3950 = vmatpush3.bf16.msra.mxu0 %v3193_v42 }
 0x8bc   : > { %v2791_v37 = vpop.f32.mrb[100].mxu0 }
 0x8bd   : > { %v3092_v7 = vadd.f32 %v4576_v36, %v2791_v37  ;;  %v3903_v38 = vpop.f32.mrb[101].mxu0 }
 0x8be   : > { %v2794_v39 = vpop.f32.mrb[102].mxu0 }
 0x8bf   : > { %v3093_v40 = vadd.f32 %v4576_v36, %v2794_v39  ;;  %v3904_v43 = vpop.f32.mrb[103].mxu0  ;;  %v3108_v44 = vsel %vm1446_vm4, %v3092_v7, -inf }
 0x8c1   : > { %v3109_v45 = vsel %vm1446_vm4, %v3093_v40, -inf }
 0x8c2   : > { %v3110_v0 = vmax.f32 %v3108_v44, %v3109_v45 }
 0x8c4   : > { %v3111_v46 = vrot.slane %v3110_v0, 4  ;;  %v2832_v47 = vpop.f32.mrb[104].mxu0 }
 0x8c5   : > { %v3094_v48 = vadd.f32 %v4576_v36, %v2832_v47  ;;  %v3909_v8 = vpop.f32.mrb[105].mxu0 }
 0x8c6   : > { %v3112_v49 = vmax.f32 %v3110_v0, %v3111_v46  ;;  %v2835_v50 = vpop.f32.mrb[106].mxu0 }
 0x8c7   : > { %v3095_v52 = vadd.f32 %v4576_v36, %v2835_v50  ;;  %v3910_v53 = vpop.f32.mrb[107].mxu0  ;;  %v3117_v55 = vsel %vm1446_vm4, %v3094_v48, -inf }
 0x8c8   : > { %v3113_v54 = vrot.slane %v3112_v49, 2 }
 0x8c9   : > { %v3118_v56 = vsel %vm1446_vm4, %v3095_v52, -inf }
 0x8ca   : > { %v3114_v57 = vmax.f32 %v3112_v49, %v3113_v54  ;;  %v3119_v58 = vmax.f32 %v3117_v55, %v3118_v56 }
 0x8cc   : > { %v3120_v59 = vrot.slane %v3119_v58, 4  ;;  %v2873_v60 = vpop.f32.mrb[108].mxu0  ;;  %v2996_v19 = vpop.f32.mrb[108].mxu1  ;;  %v3115_v2 = vrot.slane %v3114_v57, 1 }
 0x8cd   : > { %v3096_v61 = vadd.f32 %v4576_v36, %v2873_v60  ;;  %v3915_v62 = vpop.f32.mrb[109].mxu0  ;;  %v3102_v63 = vadd.f32 %v4576_v36, %v2996_v19  ;;  %v3933_v1 = vpop.f32.mrb[109].mxu1 }
 0x8ce   : > { %v3121_v3 = vmax.f32 %v3119_v58, %v3120_v59  ;;  %v2876_v4 = vpop.f32.mrb[110].mxu0  ;;  %v2999_v5 = vpop.f32.mrb[110].mxu1  ;;  %v3116_v13 = vmax.f32 %v3114_v57, %v3115_v2 }
 0x8cf   : > { %v3097_v6 = vadd.f32 %v4576_v36, %v2876_v4  ;;  %v3916_v9 = vpop.f32.mrb[111].mxu0  ;;  %v3153_v20 = vsel %vm1446_vm4, %v3102_v63, -inf  ;;  %v3103_v27 = vadd.f32 %v4576_v36, %v2999_v5  ;;  %v3934_v28 = vpop.f32.mrb[111].mxu1  ;;  %v3126_v51 = vsel %vm1446_vm4, %v3096_v61, -inf }
 0x8d0   : > { %v3122_v31 = vrot.slane %v3121_v3, 2  ;;  %v3180_v29 = vpack.c.bf16 %v3116_v13, %v3116_v13 }
 0x8d1   : > { %v3127_v32 = vsel %vm1446_vm4, %v3097_v6, -inf  ;;  %v3154_v11 = vsel %vm1446_vm4, %v3103_v27, -inf }
 0x8d2   : > { %v3123_v14 = vmax.f32 %v3121_v3, %v3122_v31  ;;  %v3128_v16 = vmax.f32 %v3126_v51, %v3127_v32  ;;  %v3155_v17 = vmax.f32 %v3153_v20, %v3154_v11  ;;  %v3209_v45 = vunpack.c.l.b16 %v3180_v29 }
 0x8d4   : > { %v3124_v10 = vrot.slane %v3123_v14, 1  ;;  %v3129_v15 = vrot.slane %v3128_v16, 4  ;;  %v2914_v21 = vpop.f32.mrb[112].mxu0  ;;  %v3078_v23 = vpop.f32.mrb[112].mxu1  ;;  %v3156_v41 = vrot.slane %v3155_v17, 4 }
 0x8d5   : > { %v3098_v24 = vadd.f32 %v4576_v36, %v2914_v21  ;;  %v3921_v25 = vpop.f32.mrb[113].mxu0  ;;  %v3106_v12 = vadd.f32 %v4576_v36, %v3078_v23  ;;  %v3945_v26 = vpop.f32.mrb[113].mxu1 }
 0x8d6   : > { %v3125_v30 = vmax.f32 %v3123_v14, %v3124_v10  ;;  %v3130_v33 = vmax.f32 %v3128_v16, %v3129_v15  ;;  %v2917_v18 = vpop.f32.mrb[114].mxu0  ;;  %v3081_v22 = vpop.f32.mrb[114].mxu1  ;;  %v3157_v48 = vmax.f32 %v3155_v17, %v3156_v41 }
 0x8d7   : > { %v3099_v34 = vadd.f32 %v4576_v36, %v2917_v18  ;;  %v3922_v35 = vpop.f32.mrb[115].mxu0  ;;  %v3107_v42 = vadd.f32 %v4576_v36, %v3081_v22  ;;  %v3946_v37 = vpop.f32.mrb[115].mxu1  ;;  %v3171_v39 = vsel %vm1446_vm4, %v3106_v12, -inf  ;;  %v3135_v40 = vsel %vm1446_vm4, %v3098_v24, -inf }
 0x8d8   : > { %v3181_v7 = vpack.c.bf16 %v3125_v30, %v3125_v30  ;;  %v3131_v38 = vrot.slane %v3130_v33, 2  ;;  %v3158_v60 = vrot.slane %v3157_v48, 2 }
 0x8d9   : > { %v3136_v43 = vsel %vm1446_vm4, %v3099_v34, -inf  ;;  %v3172_v44 = vsel %vm1446_vm4, %v3107_v42, -inf }
 0x8da   : > { %v3210_v0 = vunpack.c.l.b16 %v3181_v7  ;;  %v3132_v46 = vmax.f32 %v3130_v33, %v3131_v38  ;;  %v3137_v47 = vmax.f32 %v3135_v40, %v3136_v43  ;;  %v3173_v8 = vmax.f32 %v3171_v39, %v3172_v44 }
 0x8db   : > { %v3159_v6 = vmax.f32 %v3157_v48, %v3158_v60 }
 0x8dc   : > { %v3218_v49 = vsel %vm3217_vm7, %v3210_v0, %v3209_v45  ;;  %v3133_v50 = vrot.slane %v3132_v46, 1  ;;  %v3138_v52 = vrot.slane %v3137_v47, 4  ;;  %v2955_v53 = vpop.f32.mrb[116].mxu0  ;;  %v3174_v61 = vrot.slane %v3173_v8, 4 }
 0x8dd   : > { %v3100_v54 = vadd.f32 %v4576_v36, %v2955_v53  ;;  %v3927_v55 = vpop.f32.mrb[117].mxu0  ;;  %v3160_v16 = vrot.slane %v3159_v6, 1 }
 0x8de   : > { %v3134_v56 = vmax.f32 %v3132_v46, %v3133_v50  ;;  %v3139_v57 = vmax.f32 %v3137_v47, %v3138_v52  ;;  %v2958_v58 = vpop.f32.mrb[118].mxu0  ;;  %v3175_v9 = vmax.f32 %v3173_v8, %v3174_v61 }
 0x8df   : > { %v3101_v59 = vadd.f32 %v4576_v36, %v2958_v58  ;;  %v3928_v19 = vpop.f32.mrb[119].mxu0  ;;  %v3144_v1 = vsel %vm1446_vm4, %v3100_v54, -inf  ;;  %v3161_v30 = vmax.f32 %v3159_v6, %v3160_v16  ;;  %v3447_v54 = vld [vmem:[%s4635_s13] ss:$0 sm:$0xff] }
 0x8e0   : > { %v3182_v62 = vpack.c.bf16 %v3134_v56, %v3134_v56  ;;  %v3140_v63 = vrot.slane %v3139_v57, 2  ;;  %v3176_v10 = vrot.slane %v3175_v9, 2 }
 0x8e1   : > { %v3145_v2 = vsel %vm1446_vm4, %v3101_v59, -inf }
 0x8e2   : > { %v3211_v3 = vunpack.c.l.b16 %v3182_v62  ;;  %v3141_v4 = vmax.f32 %v3139_v57, %v3140_v63  ;;  %v3146_v5 = vmax.f32 %v3144_v1, %v3145_v2  ;;  %v3177_v33 = vmax.f32 %v3175_v9, %v3176_v10 }
 0x8e4   : > { %v3220_v20 = vsel %vm3219_vm8, %v3211_v3, %v3218_v49  ;;  %v3142_v27 = vrot.slane %v3141_v4, 1  ;;  %v3147_v28 = vrot.slane %v3146_v5, 4  ;;  %v3037_v31 = vpop.f32.mrb[120].mxu0  ;;  %v3178_v42 = vrot.slane %v3177_v33, 1 }
 0x8e5   : > { %v3104_v51 = vadd.f32 %v4576_v36, %v3037_v31  ;;  %v3939_v32 = vpop.f32.mrb[121].mxu0 }
 0x8e6   : > { %v3143_v11 = vmax.f32 %v3141_v4, %v3142_v27  ;;  %v3148_v13 = vmax.f32 %v3146_v5, %v3147_v28  ;;  %v3040_v14 = vpop.f32.mrb[122].mxu0  ;;  %v3179_v43 = vmax.f32 %v3177_v33, %v3178_v42 }
 0x8e7   : > { %v3105_v17 = vadd.f32 %v4576_v36, %v3040_v14  ;;  %v3940_v15 = vpop.f32.mrb[123].mxu0  ;;  %v3162_v24 = vsel %vm1446_vm4, %v3104_v51, -inf  ;;  %v3185_v36 = vpack.c.bf16 %v3161_v30, %v3161_v30 }
 0x8e8   : > { %v3183_v21 = vpack.c.bf16 %v3143_v11, %v3143_v11  ;;  %v3149_v23 = vrot.slane %v3148_v13, 2  ;;  %v3187_v47 = vpack.c.bf16 %v3179_v43, %v3179_v43 }
 0x8e9   : > { %v3163_v25 = vsel %vm1446_vm4, %v3105_v17, -inf  ;;  %v3214_v40 = vunpack.c.l.b16 %v3185_v36 }
 0x8ea   : > { %v3212_v12 = vunpack.c.l.b16 %v3183_v21  ;;  %v3150_v26 = vmax.f32 %v3148_v13, %v3149_v23  ;;  %v3164_v29 = vmax.f32 %v3162_v24, %v3163_v25  ;;  %v3216_v49 = vunpack.c.l.b16 %v3187_v47 }
 0x8ec   : > { %v3222_v18 = vsel %vm3221_vm9, %v3212_v12, %v3220_v20  ;;  %v3151_v22 = vrot.slane %v3150_v26, 1  ;;  %v3165_v34 = vrot.slane %v3164_v29, 4 }
 0x8ee   : > { %v3152_v35 = vmax.f32 %v3150_v26, %v3151_v22  ;;  %v3166_v41 = vmax.f32 %v3164_v29, %v3165_v34 }
 0x8f0   : > { %v3184_v37 = vpack.c.bf16 %v3152_v35, %v3152_v35  ;;  %v3167_v7 = vrot.slane %v3166_v41, 2 }
 0x8f2   : > { %v3213_v38 = vunpack.c.l.b16 %v3184_v37  ;;  %v3168_v39 = vmax.f32 %v3166_v41, %v3167_v7 }
 0x8f4   : > { %v3224_v44 = vsel %vm3223_vm10, %v3213_v38, %v3222_v18  ;;  %v3169_v45 = vrot.slane %v3168_v39, 1 }
 0x8f5   : > { %v3226_v0 = vsel %vm3225_vm11, %v3214_v40, %v3224_v44 }
 0x8f6   : > { %v3170_v46 = vmax.f32 %v3168_v39, %v3169_v45 }
 0x8f8   : > { %v3186_v48 = vpack.c.bf16 %v3170_v46, %v3170_v46 }
 0x8fa   : > { %v3215_v8 = vunpack.c.l.b16 %v3186_v48 }
 0x8fc   : > { %v3228_v50 = vsel %vm3227_vm12, %v3215_v8, %v3226_v0 }
 0x8fd   : > { %v3230_v52 = vsel %vm3229_vm13, %v3216_v49, %v3228_v50 }
 0x8fe   : > { %v3231_v53 = vpack.c.b16 %v3230_v52, %v3230_v52 }
 0x900   : > { %3952 = vmatmul.mubr.msk.bf16.vlgmr.msra.gmra.mrb[124].mxu0 %vm1446_vm4, %v3231_v53 }
 0x9d3   : > { %v3269_v55 = vpop.f32.mrb[124].mxu0 }
 0x9d4   : > { %v3270_v56 = vadd.f32 %v3447_v54, %v3269_v55  ;;  %v3953_v57 = vpop.f32.mrb[125].mxu0 }
 0x9d5   : > { %v3272_v58 = vpop.f32.mrb[126].mxu0 }
 0x9d6   : > { %3276 = vst.msk [vmem:[%s495_s19] sm:$0xff] %vm3275_vm14, %v3270_v56  ;;  %v3954_v59 = vpop.f32.mrb[127].mxu0 }
 0x9d7 PF: > { %s24_s29 = sadd.s32 1, %s3988_s29  }
 0x9d8   : > { %p21_p5 = scmp.ge.s32.totalorder %s24_s29, 4  }
 0x9da   :  { %23 = sbr.rel (!%p21_p5) target bundleno = 1 (0x1), region = 109 }

</bundles_post_ra>
